<compile_context>
chip_gen: v7x
topology: tpu7x:2x2x1
jax: 0.10.0
libtpu: 0.0.40
codegen_flags: <defaults>
</compile_context>

<pallas_src>
import jax
import jax.numpy as jnp
from jax.experimental import pallas as pl
from jax.experimental.pallas import tpu as pltpu


# ----------------------------------------------------------------------------- kernel
def _make_fused_kernel(num_layers, S, B, H, O):
    """Builds the fused (all GRU layers + FC head) kernel for static shapes."""

    def kernel(*refs):
        # refs: x, [wih, whh, bi, bhn] * num_layers, fc_w, fc_b, out
        x_ref = refs[0]                                 # (S*B, I), step-major rows
        layer_refs = refs[1:1 + 4 * num_layers]
        fcw_ref = refs[1 + 4 * num_layers]              # (1, H) if O == 1 else (H, O)
        fcb_ref = refs[2 + 4 * num_layers]              # (1, O)
        out_ref = refs[3 + 4 * num_layers]              # (B, O)

        # Hoist all weights / biases out of the step loop (loaded once).
        wih = [layer_refs[4 * l + 0][...] for l in range(num_layers)]   # (in_l, 3H)
        whh = [layer_refs[4 * l + 1][...] for l in range(num_layers)]   # (H, 3H)
        bi = [layer_refs[4 * l + 2][...] for l in range(num_layers)]    # (1, 3H)
        bhn = [layer_refs[4 * l + 3][...] for l in range(num_layers)]   # (1, H)

        # Layer-0 input projection for ALL timesteps in one MXU call: (S*B, 3H).
        gi0 = jnp.dot(x_ref[...], wih[0], preferred_element_type=jnp.float32) + bi[0]

        def cell(h, inp, w_hh, b_hn):
            # One gate-concatenated recurrent matmul per step; static lane slices.
            gh = jnp.dot(h, w_hh, preferred_element_type=jnp.float32)   # (B, 3H)
            r = jax.nn.sigmoid(inp[:, 0:H] + gh[:, 0:H])
            z = jax.nn.sigmoid(inp[:, H:2 * H] + gh[:, H:2 * H])
            n = jnp.tanh(inp[:, 2 * H:3 * H] + r * (gh[:, 2 * H:3 * H] + b_hn))
            return n + z * (h - n)

        h = [jnp.zeros((B, H), jnp.float32) for _ in range(num_layers)]
        for t in range(S):                              # S static & small: full unroll
            inp = gi0[t * B:(t + 1) * B, :]             # static value slice (no scratch)
            h[0] = cell(h[0], inp, whh[0], bhn[0])
            for l in range(1, num_layers):              # step-major wavefront
                inp = (jnp.dot(h[l - 1], wih[l], preferred_element_type=jnp.float32)
                       + bi[l])
                h[l] = cell(h[l], inp, whh[l], bhn[l])

        h_last = h[num_layers - 1]
        if O == 1:
            # VPU multiply + lane reduce; avoids a lane-sparse (H, 1) MXU matmul.
            out_ref[...] = (jnp.sum(h_last * fcw_ref[...], axis=-1, keepdims=True)
                            + fcb_ref[...])
        else:
            out_ref[...] = (jnp.dot(h_last, fcw_ref[...],
                                    preferred_element_type=jnp.float32)
                            + fcb_ref[...])

    return kernel


# ----------------------------------------------------------------------------- wrapper
_VMEM = pl.BlockSpec(memory_space=pltpu.MemorySpace.VMEM)


def prepare_params(params):
    """Convert torch-layout params into the kernel layout (done ONCE, outside the kernel).

    torch layout per layer: wih (3H, in), whh (3H, H), bih (3H,), bhh (3H,)
    kernel layout per layer:
        wih (in, 3H)  -- gates concatenated on the lane axis, pre-transposed for MXU
        whh (H, 3H)   -- same
        bi  (1, 3H)   -- bih with bhh folded in for the r and z gates
        bhn (1, H)    -- hidden bias of the n gate (gated by r, stays separate)
    """
    layers = []
    for layer in params["gru"]:
        H = layer["whh"].shape[1]
        wih = layer["wih"].T.astype(jnp.float32)                 # (in, 3H)
        whh = layer["whh"].T.astype(jnp.float32)                 # (H, 3H)
        bih, bhh = layer["bih"], layer["bhh"]
        bi = jnp.concatenate([bih[:2 * H] + bhh[:2 * H], bih[2 * H:]]
                             ).reshape(1, 3 * H).astype(jnp.float32)
        bhn = bhh[2 * H:].reshape(1, H).astype(jnp.float32)
        layers.append((wih, whh, bi, bhn))

    O = params["fc_w"].shape[0]
    # O == 1: keep torch (O, H) row layout for the in-kernel VPU reduction.
    fc_w = params["fc_w"] if O == 1 else params["fc_w"].T        # (1, H) or (H, O)
    return dict(
        layers=layers,
        fc_w=fc_w.astype(jnp.float32),
        fc_b=params["fc_b"].reshape(1, O).astype(jnp.float32),
    )


@jax.jit
def gru_forward(x_bsi, kparams):
    """x_bsi: (batch, seq, input) -> (batch, output). kparams from prepare_params()."""
    B, S, I = x_bsi.shape
    # Flatten to step-major 2D OUTSIDE the kernel (no in-kernel relayouts).
    x = jnp.transpose(x_bsi, (1, 0, 2)).reshape(S * B, I).astype(jnp.float32)

    H = kparams["layers"][0][1].shape[0]
    O = kparams["fc_b"].shape[1]
    num_layers = len(kparams["layers"])

    args = [x]
    for (wih, whh, bi, bhn) in kparams["layers"]:
        args += [wih, whh, bi, bhn]
    args += [kparams["fc_w"], kparams["fc_b"]]

    return pl.pallas_call(
        _make_fused_kernel(num_layers, S, B, H, O),
        out_shape=jax.ShapeDtypeStruct((B, O), jnp.float32),
        in_specs=[_VMEM] * len(args),
        out_specs=_VMEM,
    )(*args)


# ----------------------------------------------------------------------------- params (torch layout)
def init_params(key, input_size, hidden_size, num_layers, output_size):
    def uni(k, shape, bound):
        return jax.random.uniform(k, shape, jnp.float32, -bound, bound)

    bound = hidden_size ** -0.5
    layers = []
    for l in range(num_layers):
        in_sz = input_size if l == 0 else hidden_size
        key, k1, k2, k3, k4 = jax.random.split(key, 5)
        layers.append(
            dict(
                wih=uni(k1, (3 * hidden_size, in_sz), bound),
                whh=uni(k2, (3 * hidden_size, hidden_size), bound),
                bih=uni(k3, (3 * hidden_size,), bound),
                bhh=uni(k4, (3 * hidden_size,), bound),
            )
        )
    key, k5, k6 = jax.random.split(key, 3)
    return dict(
        gru=layers,
        fc_w=uni(k5, (output_size, hidden_size), bound),
        fc_b=uni(k6, (output_size,), bound),
    )


# ----------------------------------------------------------------------------- pure-JAX reference
def gru_forward_ref(x_bsi, params):
    x = jnp.transpose(x_bsi, (1, 0, 2))
    for layer in params["gru"]:
        S, B, _ = x.shape
        H = layer["whh"].shape[1]
        h = jnp.zeros((B, H), jnp.float32)
        outs = []
        for t in range(S):
            gi = x[t] @ layer["wih"].T + layer["bih"]
            gh = h @ layer["whh"].T + layer["bhh"]
            r = jax.nn.sigmoid(gi[:, :H] + gh[:, :H])
            z = jax.nn.sigmoid(gi[:, H:2 * H] + gh[:, H:2 * H])
            n = jnp.tanh(gi[:, 2 * H:] + r * gh[:, 2 * H:])
            h = (1.0 - z) * n + z * h
            outs.append(h)
        x = jnp.stack(outs, axis=0)
    return x[-1] @ params["fc_w"].T + params["fc_b"]


# ----------------------------------------------------------------------------- main
if __name__ == "__main__":
    batch, seq, input_size = 4, 8, 8
    hidden_size, num_layers, output_size = 32, 2, 1

    key = jax.random.PRNGKey(0)
    kx, kp = jax.random.split(key)
    x = jax.random.normal(kx, (batch, seq, input_size), jnp.float32)
    params = init_params(kp, input_size, hidden_size, num_layers, output_size)
    kparams = prepare_params(params)   # one-time weight re-layout, outside the kernel

    y = gru_forward(x, kparams)
    jax.block_until_ready(y)

    y_ref = gru_forward_ref(x, params)
    assert y.shape == (batch, output_size)
    assert jnp.allclose(y, y_ref, atol=1e-4, rtol=1e-4), "mismatch vs reference"

    print("KERNEL_OK")
</pallas_src>

<mosaic_0001>
module attributes {stable_mosaic.version = 11 : i64} {
  func.func @kernel(%arg0: memref<32x8xf32, #tpu.memory_space<vmem>>, %arg1: memref<8x96xf32, #tpu.memory_space<vmem>>, %arg2: memref<32x96xf32, #tpu.memory_space<vmem>>, %arg3: memref<1x96xf32, #tpu.memory_space<vmem>>, %arg4: memref<1x32xf32, #tpu.memory_space<vmem>>, %arg5: memref<32x96xf32, #tpu.memory_space<vmem>>, %arg6: memref<32x96xf32, #tpu.memory_space<vmem>>, %arg7: memref<1x96xf32, #tpu.memory_space<vmem>>, %arg8: memref<1x32xf32, #tpu.memory_space<vmem>>, %arg9: memref<1x32xf32, #tpu.memory_space<vmem>>, %arg10: memref<1x1xf32, #tpu.memory_space<vmem>>, %arg11: memref<4x1xf32, #tpu.memory_space<vmem>>) attributes {dimension_semantics = [], scalar_prefetch = 0 : i64, scratch_operands = 0 : i64, tpu.core_type = #tpu.core_type<tc>} {
    %c0 = arith.constant 0 : index
    %c0_0 = arith.constant 0 : index
    %0 = vector.load %arg1[%c0, %c0_0] : memref<8x96xf32, #tpu.memory_space<vmem>>, vector<8x96xf32>
    %c0_1 = arith.constant 0 : index
    %c0_2 = arith.constant 0 : index
    %1 = vector.load %arg5[%c0_1, %c0_2] : memref<32x96xf32, #tpu.memory_space<vmem>>, vector<32x96xf32>
    %c0_3 = arith.constant 0 : index
    %c0_4 = arith.constant 0 : index
    %2 = vector.load %arg2[%c0_3, %c0_4] : memref<32x96xf32, #tpu.memory_space<vmem>>, vector<32x96xf32>
    %c0_5 = arith.constant 0 : index
    %c0_6 = arith.constant 0 : index
    %3 = vector.load %arg6[%c0_5, %c0_6] : memref<32x96xf32, #tpu.memory_space<vmem>>, vector<32x96xf32>
    %c0_7 = arith.constant 0 : index
    %c0_8 = arith.constant 0 : index
    %4 = vector.load %arg3[%c0_7, %c0_8] : memref<1x96xf32, #tpu.memory_space<vmem>>, vector<1x96xf32>
    %c0_9 = arith.constant 0 : index
    %c0_10 = arith.constant 0 : index
    %5 = vector.load %arg7[%c0_9, %c0_10] : memref<1x96xf32, #tpu.memory_space<vmem>>, vector<1x96xf32>
    %c0_11 = arith.constant 0 : index
    %c0_12 = arith.constant 0 : index
    %6 = vector.load %arg4[%c0_11, %c0_12] : memref<1x32xf32, #tpu.memory_space<vmem>>, vector<1x32xf32>
    %c0_13 = arith.constant 0 : index
    %c0_14 = arith.constant 0 : index
    %7 = vector.load %arg8[%c0_13, %c0_14] : memref<1x32xf32, #tpu.memory_space<vmem>>, vector<1x32xf32>
    %c0_15 = arith.constant 0 : index
    %c0_16 = arith.constant 0 : index
    %8 = vector.load %arg0[%c0_15, %c0_16] : memref<32x8xf32, #tpu.memory_space<vmem>>, vector<32x8xf32>
    %cst = arith.constant dense<0.000000e+00> : vector<32x96xf32>
    %9 = tpu.matmul %8, %0, %cst {dimension_numbers = #tpu.dot_dimension_numbers<[1], [0], [0], [1], [0, 0, 1, 1], [], []>} : vector<32x8xf32>, vector<8x96xf32>, vector<32x96xf32> -> vector<32x96xf32>
    %10 = vector.broadcast %4 : vector<1x96xf32> to vector<32x96xf32>
    %11 = arith.addf %9, %10 : vector<32x96xf32>
    %cst_17 = arith.constant 0.000000e+00 : f32
    %12 = vector.broadcast %cst_17 : f32 to vector<4x32xf32>
    %cst_18 = arith.constant 0.000000e+00 : f32
    %13 = vector.broadcast %cst_18 : f32 to vector<4x32xf32>
    %14 = vector.extract_strided_slice %11 {offsets = [0, 0], sizes = [4, 96], strides = [1, 1]} : vector<32x96xf32> to vector<4x96xf32>
    %cst_19 = arith.constant dense<0.000000e+00> : vector<4x96xf32>
    %15 = tpu.matmul %12, %2, %cst_19 {dimension_numbers = #tpu.dot_dimension_numbers<[1], [0], [0], [1], [0, 0, 1, 1], [], []>} : vector<4x32xf32>, vector<32x96xf32>, vector<4x96xf32> -> vector<4x96xf32>
    %16 = vector.extract_strided_slice %14 {offsets = [0, 0], sizes = [4, 32], strides = [1, 1]} : vector<4x96xf32> to vector<4x32xf32>
    %17 = vector.extract_strided_slice %15 {offsets = [0, 0], sizes = [4, 32], strides = [1, 1]} : vector<4x96xf32> to vector<4x32xf32>
    %18 = arith.addf %16, %17 : vector<4x32xf32>
    %19 = arith.negf %18 : vector<4x32xf32>
    %20 = math.exp %19 : vector<4x32xf32>
    %cst_20 = arith.constant 1.000000e+00 : f32
    %21 = vector.broadcast %cst_20 : f32 to vector<4x32xf32>
    %22 = arith.addf %21, %20 : vector<4x32xf32>
    %23 = arith.divf %21, %22 : vector<4x32xf32>
    %24 = vector.extract_strided_slice %14 {offsets = [0, 32], sizes = [4, 32], strides = [1, 1]} : vector<4x96xf32> to vector<4x32xf32>
    %25 = vector.extract_strided_slice %15 {offsets = [0, 32], sizes = [4, 32], strides = [1, 1]} : vector<4x96xf32> to vector<4x32xf32>
    %26 = arith.addf %24, %25 : vector<4x32xf32>
    %27 = arith.negf %26 : vector<4x32xf32>
    %28 = math.exp %27 : vector<4x32xf32>
    %cst_21 = arith.constant 1.000000e+00 : f32
    %29 = vector.broadcast %cst_21 : f32 to vector<4x32xf32>
    %30 = arith.addf %29, %28 : vector<4x32xf32>
    %31 = arith.divf %29, %30 : vector<4x32xf32>
    %32 = vector.extract_strided_slice %14 {offsets = [0, 64], sizes = [4, 32], strides = [1, 1]} : vector<4x96xf32> to vector<4x32xf32>
    %33 = vector.extract_strided_slice %15 {offsets = [0, 64], sizes = [4, 32], strides = [1, 1]} : vector<4x96xf32> to vector<4x32xf32>
    %34 = vector.broadcast %6 : vector<1x32xf32> to vector<4x32xf32>
    %35 = arith.addf %33, %34 : vector<4x32xf32>
    %36 = arith.mulf %23, %35 : vector<4x32xf32>
    %37 = arith.addf %32, %36 : vector<4x32xf32>
    %38 = math.tanh %37 : vector<4x32xf32>
    %39 = arith.subf %12, %38 : vector<4x32xf32>
    %40 = arith.mulf %31, %39 : vector<4x32xf32>
    %41 = arith.addf %38, %40 : vector<4x32xf32>
    %cst_22 = arith.constant dense<0.000000e+00> : vector<4x96xf32>
    %42 = tpu.matmul %41, %1, %cst_22 {dimension_numbers = #tpu.dot_dimension_numbers<[1], [0], [0], [1], [0, 0, 1, 1], [], []>} : vector<4x32xf32>, vector<32x96xf32>, vector<4x96xf32> -> vector<4x96xf32>
    %43 = vector.broadcast %5 : vector<1x96xf32> to vector<4x96xf32>
    %44 = arith.addf %42, %43 : vector<4x96xf32>
    %cst_23 = arith.constant dense<0.000000e+00> : vector<4x96xf32>
    %45 = tpu.matmul %13, %3, %cst_23 {dimension_numbers = #tpu.dot_dimension_numbers<[1], [0], [0], [1], [0, 0, 1, 1], [], []>} : vector<4x32xf32>, vector<32x96xf32>, vector<4x96xf32> -> vector<4x96xf32>
    %46 = vector.extract_strided_slice %44 {offsets = [0, 0], sizes = [4, 32], strides = [1, 1]} : vector<4x96xf32> to vector<4x32xf32>
    %47 = vector.extract_strided_slice %45 {offsets = [0, 0], sizes = [4, 32], strides = [1, 1]} : vector<4x96xf32> to vector<4x32xf32>
    %48 = arith.addf %46, %47 : vector<4x32xf32>
    %49 = arith.negf %48 : vector<4x32xf32>
    %50 = math.exp %49 : vector<4x32xf32>
    %cst_24 = arith.constant 1.000000e+00 : f32
    %51 = vector.broadcast %cst_24 : f32 to vector<4x32xf32>
    %52 = arith.addf %51, %50 : vector<4x32xf32>
    %53 = arith.divf %51, %52 : vector<4x32xf32>
    %54 = vector.extract_strided_slice %44 {offsets = [0, 32], sizes = [4, 32], strides = [1, 1]} : vector<4x96xf32> to vector<4x32xf32>
    %55 = vector.extract_strided_slice %45 {offsets = [0, 32], sizes = [4, 32], strides = [1, 1]} : vector<4x96xf32> to vector<4x32xf32>
    %56 = arith.addf %54, %55 : vector<4x32xf32>
    %57 = arith.negf %56 : vector<4x32xf32>
    %58 = math.exp %57 : vector<4x32xf32>
    %cst_25 = arith.constant 1.000000e+00 : f32
    %59 = vector.broadcast %cst_25 : f32 to vector<4x32xf32>
    %60 = arith.addf %59, %58 : vector<4x32xf32>
    %61 = arith.divf %59, %60 : vector<4x32xf32>
    %62 = vector.extract_strided_slice %44 {offsets = [0, 64], sizes = [4, 32], strides = [1, 1]} : vector<4x96xf32> to vector<4x32xf32>
    %63 = vector.extract_strided_slice %45 {offsets = [0, 64], sizes = [4, 32], strides = [1, 1]} : vector<4x96xf32> to vector<4x32xf32>
    %64 = vector.broadcast %7 : vector<1x32xf32> to vector<4x32xf32>
    %65 = arith.addf %63, %64 : vector<4x32xf32>
    %66 = arith.mulf %53, %65 : vector<4x32xf32>
    %67 = arith.addf %62, %66 : vector<4x32xf32>
    %68 = math.tanh %67 : vector<4x32xf32>
    %69 = arith.subf %13, %68 : vector<4x32xf32>
    %70 = arith.mulf %61, %69 : vector<4x32xf32>
    %71 = arith.addf %68, %70 : vector<4x32xf32>
    %72 = vector.extract_strided_slice %11 {offsets = [4, 0], sizes = [4, 96], strides = [1, 1]} : vector<32x96xf32> to vector<4x96xf32>
    %cst_26 = arith.constant dense<0.000000e+00> : vector<4x96xf32>
    %73 = tpu.matmul %41, %2, %cst_26 {dimension_numbers = #tpu.dot_dimension_numbers<[1], [0], [0], [1], [0, 0, 1, 1], [], []>} : vector<4x32xf32>, vector<32x96xf32>, vector<4x96xf32> -> vector<4x96xf32>
    %74 = vector.extract_strided_slice %72 {offsets = [0, 0], sizes = [4, 32], strides = [1, 1]} : vector<4x96xf32> to vector<4x32xf32>
    %75 = vector.extract_strided_slice %73 {offsets = [0, 0], sizes = [4, 32], strides = [1, 1]} : vector<4x96xf32> to vector<4x32xf32>
    %76 = arith.addf %74, %75 : vector<4x32xf32>
    %77 = arith.negf %76 : vector<4x32xf32>
    %78 = math.exp %77 : vector<4x32xf32>
    %cst_27 = arith.constant 1.000000e+00 : f32
    %79 = vector.broadcast %cst_27 : f32 to vector<4x32xf32>
    %80 = arith.addf %79, %78 : vector<4x32xf32>
    %81 = arith.divf %79, %80 : vector<4x32xf32>
    %82 = vector.extract_strided_slice %72 {offsets = [0, 32], sizes = [4, 32], strides = [1, 1]} : vector<4x96xf32> to vector<4x32xf32>
    %83 = vector.extract_strided_slice %73 {offsets = [0, 32], sizes = [4, 32], strides = [1, 1]} : vector<4x96xf32> to vector<4x32xf32>
    %84 = arith.addf %82, %83 : vector<4x32xf32>
    %85 = arith.negf %84 : vector<4x32xf32>
    %86 = math.exp %85 : vector<4x32xf32>
    %cst_28 = arith.constant 1.000000e+00 : f32
    %87 = vector.broadcast %cst_28 : f32 to vector<4x32xf32>
    %88 = arith.addf %87, %86 : vector<4x32xf32>
    %89 = arith.divf %87, %88 : vector<4x32xf32>
    %90 = vector.extract_strided_slice %72 {offsets = [0, 64], sizes = [4, 32], strides = [1, 1]} : vector<4x96xf32> to vector<4x32xf32>
    %91 = vector.extract_strided_slice %73 {offsets = [0, 64], sizes = [4, 32], strides = [1, 1]} : vector<4x96xf32> to vector<4x32xf32>
    %92 = vector.broadcast %6 : vector<1x32xf32> to vector<4x32xf32>
    %93 = arith.addf %91, %92 : vector<4x32xf32>
    %94 = arith.mulf %81, %93 : vector<4x32xf32>
    %95 = arith.addf %90, %94 : vector<4x32xf32>
    %96 = math.tanh %95 : vector<4x32xf32>
    %97 = arith.subf %41, %96 : vector<4x32xf32>
    %98 = arith.mulf %89, %97 : vector<4x32xf32>
    %99 = arith.addf %96, %98 : vector<4x32xf32>
    %cst_29 = arith.constant dense<0.000000e+00> : vector<4x96xf32>
    %100 = tpu.matmul %99, %1, %cst_29 {dimension_numbers = #tpu.dot_dimension_numbers<[1], [0], [0], [1], [0, 0, 1, 1], [], []>} : vector<4x32xf32>, vector<32x96xf32>, vector<4x96xf32> -> vector<4x96xf32>
    %101 = vector.broadcast %5 : vector<1x96xf32> to vector<4x96xf32>
    %102 = arith.addf %100, %101 : vector<4x96xf32>
    %cst_30 = arith.constant dense<0.000000e+00> : vector<4x96xf32>
    %103 = tpu.matmul %71, %3, %cst_30 {dimension_numbers = #tpu.dot_dimension_numbers<[1], [0], [0], [1], [0, 0, 1, 1], [], []>} : vector<4x32xf32>, vector<32x96xf32>, vector<4x96xf32> -> vector<4x96xf32>
    %104 = vector.extract_strided_slice %102 {offsets = [0, 0], sizes = [4, 32], strides = [1, 1]} : vector<4x96xf32> to vector<4x32xf32>
    %105 = vector.extract_strided_slice %103 {offsets = [0, 0], sizes = [4, 32], strides = [1, 1]} : vector<4x96xf32> to vector<4x32xf32>
    %106 = arith.addf %104, %105 : vector<4x32xf32>
    %107 = arith.negf %106 : vector<4x32xf32>
    %108 = math.exp %107 : vector<4x32xf32>
    %cst_31 = arith.constant 1.000000e+00 : f32
    %109 = vector.broadcast %cst_31 : f32 to vector<4x32xf32>
    %110 = arith.addf %109, %108 : vector<4x32xf32>
    %111 = arith.divf %109, %110 : vector<4x32xf32>
    %112 = vector.extract_strided_slice %102 {offsets = [0, 32], sizes = [4, 32], strides = [1, 1]} : vector<4x96xf32> to vector<4x32xf32>
    %113 = vector.extract_strided_slice %103 {offsets = [0, 32], sizes = [4, 32], strides = [1, 1]} : vector<4x96xf32> to vector<4x32xf32>
    %114 = arith.addf %112, %113 : vector<4x32xf32>
    %115 = arith.negf %114 : vector<4x32xf32>
    %116 = math.exp %115 : vector<4x32xf32>
    %cst_32 = arith.constant 1.000000e+00 : f32
    %117 = vector.broadcast %cst_32 : f32 to vector<4x32xf32>
    %118 = arith.addf %117, %116 : vector<4x32xf32>
    %119 = arith.divf %117, %118 : vector<4x32xf32>
    %120 = vector.extract_strided_slice %102 {offsets = [0, 64], sizes = [4, 32], strides = [1, 1]} : vector<4x96xf32> to vector<4x32xf32>
    %121 = vector.extract_strided_slice %103 {offsets = [0, 64], sizes = [4, 32], strides = [1, 1]} : vector<4x96xf32> to vector<4x32xf32>
    %122 = vector.broadcast %7 : vector<1x32xf32> to vector<4x32xf32>
    %123 = arith.addf %121, %122 : vector<4x32xf32>
    %124 = arith.mulf %111, %123 : vector<4x32xf32>
    %125 = arith.addf %120, %124 : vector<4x32xf32>
    %126 = math.tanh %125 : vector<4x32xf32>
    %127 = arith.subf %71, %126 : vector<4x32xf32>
    %128 = arith.mulf %119, %127 : vector<4x32xf32>
    %129 = arith.addf %126, %128 : vector<4x32xf32>
    %130 = vector.extract_strided_slice %11 {offsets = [8, 0], sizes = [4, 96], strides = [1, 1]} : vector<32x96xf32> to vector<4x96xf32>
    %cst_33 = arith.constant dense<0.000000e+00> : vector<4x96xf32>
    %131 = tpu.matmul %99, %2, %cst_33 {dimension_numbers = #tpu.dot_dimension_numbers<[1], [0], [0], [1], [0, 0, 1, 1], [], []>} : vector<4x32xf32>, vector<32x96xf32>, vector<4x96xf32> -> vector<4x96xf32>
    %132 = vector.extract_strided_slice %130 {offsets = [0, 0], sizes = [4, 32], strides = [1, 1]} : vector<4x96xf32> to vector<4x32xf32>
    %133 = vector.extract_strided_slice %131 {offsets = [0, 0], sizes = [4, 32], strides = [1, 1]} : vector<4x96xf32> to vector<4x32xf32>
    %134 = arith.addf %132, %133 : vector<4x32xf32>
    %135 = arith.negf %134 : vector<4x32xf32>
    %136 = math.exp %135 : vector<4x32xf32>
    %cst_34 = arith.constant 1.000000e+00 : f32
    %137 = vector.broadcast %cst_34 : f32 to vector<4x32xf32>
    %138 = arith.addf %137, %136 : vector<4x32xf32>
    %139 = arith.divf %137, %138 : vector<4x32xf32>
    %140 = vector.extract_strided_slice %130 {offsets = [0, 32], sizes = [4, 32], strides = [1, 1]} : vector<4x96xf32> to vector<4x32xf32>
    %141 = vector.extract_strided_slice %131 {offsets = [0, 32], sizes = [4, 32], strides = [1, 1]} : vector<4x96xf32> to vector<4x32xf32>
    %142 = arith.addf %140, %141 : vector<4x32xf32>
    %143 = arith.negf %142 : vector<4x32xf32>
    %144 = math.exp %143 : vector<4x32xf32>
    %cst_35 = arith.constant 1.000000e+00 : f32
    %145 = vector.broadcast %cst_35 : f32 to vector<4x32xf32>
    %146 = arith.addf %145, %144 : vector<4x32xf32>
    %147 = arith.divf %145, %146 : vector<4x32xf32>
    %148 = vector.extract_strided_slice %130 {offsets = [0, 64], sizes = [4, 32], strides = [1, 1]} : vector<4x96xf32> to vector<4x32xf32>
    %149 = vector.extract_strided_slice %131 {offsets = [0, 64], sizes = [4, 32], strides = [1, 1]} : vector<4x96xf32> to vector<4x32xf32>
    %150 = vector.broadcast %6 : vector<1x32xf32> to vector<4x32xf32>
    %151 = arith.addf %149, %150 : vector<4x32xf32>
    %152 = arith.mulf %139, %151 : vector<4x32xf32>
    %153 = arith.addf %148, %152 : vector<4x32xf32>
    %154 = math.tanh %153 : vector<4x32xf32>
    %155 = arith.subf %99, %154 : vector<4x32xf32>
    %156 = arith.mulf %147, %155 : vector<4x32xf32>
    %157 = arith.addf %154, %156 : vector<4x32xf32>
    %cst_36 = arith.constant dense<0.000000e+00> : vector<4x96xf32>
    %158 = tpu.matmul %157, %1, %cst_36 {dimension_numbers = #tpu.dot_dimension_numbers<[1], [0], [0], [1], [0, 0, 1, 1], [], []>} : vector<4x32xf32>, vector<32x96xf32>, vector<4x96xf32> -> vector<4x96xf32>
    %159 = vector.broadcast %5 : vector<1x96xf32> to vector<4x96xf32>
    %160 = arith.addf %158, %159 : vector<4x96xf32>
    %cst_37 = arith.constant dense<0.000000e+00> : vector<4x96xf32>
    %161 = tpu.matmul %129, %3, %cst_37 {dimension_numbers = #tpu.dot_dimension_numbers<[1], [0], [0], [1], [0, 0, 1, 1], [], []>} : vector<4x32xf32>, vector<32x96xf32>, vector<4x96xf32> -> vector<4x96xf32>
    %162 = vector.extract_strided_slice %160 {offsets = [0, 0], sizes = [4, 32], strides = [1, 1]} : vector<4x96xf32> to vector<4x32xf32>
    %163 = vector.extract_strided_slice %161 {offsets = [0, 0], sizes = [4, 32], strides = [1, 1]} : vector<4x96xf32> to vector<4x32xf32>
    %164 = arith.addf %162, %163 : vector<4x32xf32>
    %165 = arith.negf %164 : vector<4x32xf32>
    %166 = math.exp %165 : vector<4x32xf32>
    %cst_38 = arith.constant 1.000000e+00 : f32
    %167 = vector.broadcast %cst_38 : f32 to vector<4x32xf32>
    %168 = arith.addf %167, %166 : vector<4x32xf32>
    %169 = arith.divf %167, %168 : vector<4x32xf32>
    %170 = vector.extract_strided_slice %160 {offsets = [0, 32], sizes = [4, 32], strides = [1, 1]} : vector<4x96xf32> to vector<4x32xf32>
    %171 = vector.extract_strided_slice %161 {offsets = [0, 32], sizes = [4, 32], strides = [1, 1]} : vector<4x96xf32> to vector<4x32xf32>
    %172 = arith.addf %170, %171 : vector<4x32xf32>
    %173 = arith.negf %172 : vector<4x32xf32>
    %174 = math.exp %173 : vector<4x32xf32>
    %cst_39 = arith.constant 1.000000e+00 : f32
    %175 = vector.broadcast %cst_39 : f32 to vector<4x32xf32>
    %176 = arith.addf %175, %174 : vector<4x32xf32>
    %177 = arith.divf %175, %176 : vector<4x32xf32>
    %178 = vector.extract_strided_slice %160 {offsets = [0, 64], sizes = [4, 32], strides = [1, 1]} : vector<4x96xf32> to vector<4x32xf32>
    %179 = vector.extract_strided_slice %161 {offsets = [0, 64], sizes = [4, 32], strides = [1, 1]} : vector<4x96xf32> to vector<4x32xf32>
    %180 = vector.broadcast %7 : vector<1x32xf32> to vector<4x32xf32>
    %181 = arith.addf %179, %180 : vector<4x32xf32>
    %182 = arith.mulf %169, %181 : vector<4x32xf32>
    %183 = arith.addf %178, %182 : vector<4x32xf32>
    %184 = math.tanh %183 : vector<4x32xf32>
    %185 = arith.subf %129, %184 : vector<4x32xf32>
    %186 = arith.mulf %177, %185 : vector<4x32xf32>
    %187 = arith.addf %184, %186 : vector<4x32xf32>
    %188 = vector.extract_strided_slice %11 {offsets = [12, 0], sizes = [4, 96], strides = [1, 1]} : vector<32x96xf32> to vector<4x96xf32>
    %cst_40 = arith.constant dense<0.000000e+00> : vector<4x96xf32>
    %189 = tpu.matmul %157, %2, %cst_40 {dimension_numbers = #tpu.dot_dimension_numbers<[1], [0], [0], [1], [0, 0, 1, 1], [], []>} : vector<4x32xf32>, vector<32x96xf32>, vector<4x96xf32> -> vector<4x96xf32>
    %190 = vector.extract_strided_slice %188 {offsets = [0, 0], sizes = [4, 32], strides = [1, 1]} : vector<4x96xf32> to vector<4x32xf32>
    %191 = vector.extract_strided_slice %189 {offsets = [0, 0], sizes = [4, 32], strides = [1, 1]} : vector<4x96xf32> to vector<4x32xf32>
    %192 = arith.addf %190, %191 : vector<4x32xf32>
    %193 = arith.negf %192 : vector<4x32xf32>
    %194 = math.exp %193 : vector<4x32xf32>
    %cst_41 = arith.constant 1.000000e+00 : f32
    %195 = vector.broadcast %cst_41 : f32 to vector<4x32xf32>
    %196 = arith.addf %195, %194 : vector<4x32xf32>
    %197 = arith.divf %195, %196 : vector<4x32xf32>
    %198 = vector.extract_strided_slice %188 {offsets = [0, 32], sizes = [4, 32], strides = [1, 1]} : vector<4x96xf32> to vector<4x32xf32>
    %199 = vector.extract_strided_slice %189 {offsets = [0, 32], sizes = [4, 32], strides = [1, 1]} : vector<4x96xf32> to vector<4x32xf32>
    %200 = arith.addf %198, %199 : vector<4x32xf32>
    %201 = arith.negf %200 : vector<4x32xf32>
    %202 = math.exp %201 : vector<4x32xf32>
    %cst_42 = arith.constant 1.000000e+00 : f32
    %203 = vector.broadcast %cst_42 : f32 to vector<4x32xf32>
    %204 = arith.addf %203, %202 : vector<4x32xf32>
    %205 = arith.divf %203, %204 : vector<4x32xf32>
    %206 = vector.extract_strided_slice %188 {offsets = [0, 64], sizes = [4, 32], strides = [1, 1]} : vector<4x96xf32> to vector<4x32xf32>
    %207 = vector.extract_strided_slice %189 {offsets = [0, 64], sizes = [4, 32], strides = [1, 1]} : vector<4x96xf32> to vector<4x32xf32>
    %208 = vector.broadcast %6 : vector<1x32xf32> to vector<4x32xf32>
    %209 = arith.addf %207, %208 : vector<4x32xf32>
    %210 = arith.mulf %197, %209 : vector<4x32xf32>
    %211 = arith.addf %206, %210 : vector<4x32xf32>
    %212 = math.tanh %211 : vector<4x32xf32>
    %213 = arith.subf %157, %212 : vector<4x32xf32>
    %214 = arith.mulf %205, %213 : vector<4x32xf32>
    %215 = arith.addf %212, %214 : vector<4x32xf32>
    %cst_43 = arith.constant dense<0.000000e+00> : vector<4x96xf32>
    %216 = tpu.matmul %215, %1, %cst_43 {dimension_numbers = #tpu.dot_dimension_numbers<[1], [0], [0], [1], [0, 0, 1, 1], [], []>} : vector<4x32xf32>, vector<32x96xf32>, vector<4x96xf32> -> vector<4x96xf32>
    %217 = vector.broadcast %5 : vector<1x96xf32> to vector<4x96xf32>
    %218 = arith.addf %216, %217 : vector<4x96xf32>
    %cst_44 = arith.constant dense<0.000000e+00> : vector<4x96xf32>
    %219 = tpu.matmul %187, %3, %cst_44 {dimension_numbers = #tpu.dot_dimension_numbers<[1], [0], [0], [1], [0, 0, 1, 1], [], []>} : vector<4x32xf32>, vector<32x96xf32>, vector<4x96xf32> -> vector<4x96xf32>
    %220 = vector.extract_strided_slice %218 {offsets = [0, 0], sizes = [4, 32], strides = [1, 1]} : vector<4x96xf32> to vector<4x32xf32>
    %221 = vector.extract_strided_slice %219 {offsets = [0, 0], sizes = [4, 32], strides = [1, 1]} : vector<4x96xf32> to vector<4x32xf32>
    %222 = arith.addf %220, %221 : vector<4x32xf32>
    %223 = arith.negf %222 : vector<4x32xf32>
    %224 = math.exp %223 : vector<4x32xf32>
    %cst_45 = arith.constant 1.000000e+00 : f32
    %225 = vector.broadcast %cst_45 : f32 to vector<4x32xf32>
    %226 = arith.addf %225, %224 : vector<4x32xf32>
    %227 = arith.divf %225, %226 : vector<4x32xf32>
    %228 = vector.extract_strided_slice %218 {offsets = [0, 32], sizes = [4, 32], strides = [1, 1]} : vector<4x96xf32> to vector<4x32xf32>
    %229 = vector.extract_strided_slice %219 {offsets = [0, 32], sizes = [4, 32], strides = [1, 1]} : vector<4x96xf32> to vector<4x32xf32>
    %230 = arith.addf %228, %229 : vector<4x32xf32>
    %231 = arith.negf %230 : vector<4x32xf32>
    %232 = math.exp %231 : vector<4x32xf32>
    %cst_46 = arith.constant 1.000000e+00 : f32
    %233 = vector.broadcast %cst_46 : f32 to vector<4x32xf32>
    %234 = arith.addf %233, %232 : vector<4x32xf32>
    %235 = arith.divf %233, %234 : vector<4x32xf32>
    %236 = vector.extract_strided_slice %218 {offsets = [0, 64], sizes = [4, 32], strides = [1, 1]} : vector<4x96xf32> to vector<4x32xf32>
    %237 = vector.extract_strided_slice %219 {offsets = [0, 64], sizes = [4, 32], strides = [1, 1]} : vector<4x96xf32> to vector<4x32xf32>
    %238 = vector.broadcast %7 : vector<1x32xf32> to vector<4x32xf32>
    %239 = arith.addf %237, %238 : vector<4x32xf32>
    %240 = arith.mulf %227, %239 : vector<4x32xf32>
    %241 = arith.addf %236, %240 : vector<4x32xf32>
    %242 = math.tanh %241 : vector<4x32xf32>
    %243 = arith.subf %187, %242 : vector<4x32xf32>
    %244 = arith.mulf %235, %243 : vector<4x32xf32>
    %245 = arith.addf %242, %244 : vector<4x32xf32>
    %246 = vector.extract_strided_slice %11 {offsets = [16, 0], sizes = [4, 96], strides = [1, 1]} : vector<32x96xf32> to vector<4x96xf32>
    %cst_47 = arith.constant dense<0.000000e+00> : vector<4x96xf32>
    %247 = tpu.matmul %215, %2, %cst_47 {dimension_numbers = #tpu.dot_dimension_numbers<[1], [0], [0], [1], [0, 0, 1, 1], [], []>} : vector<4x32xf32>, vector<32x96xf32>, vector<4x96xf32> -> vector<4x96xf32>
    %248 = vector.extract_strided_slice %246 {offsets = [0, 0], sizes = [4, 32], strides = [1, 1]} : vector<4x96xf32> to vector<4x32xf32>
    %249 = vector.extract_strided_slice %247 {offsets = [0, 0], sizes = [4, 32], strides = [1, 1]} : vector<4x96xf32> to vector<4x32xf32>
    %250 = arith.addf %248, %249 : vector<4x32xf32>
    %251 = arith.negf %250 : vector<4x32xf32>
    %252 = math.exp %251 : vector<4x32xf32>
    %cst_48 = arith.constant 1.000000e+00 : f32
    %253 = vector.broadcast %cst_48 : f32 to vector<4x32xf32>
    %254 = arith.addf %253, %252 : vector<4x32xf32>
    %255 = arith.divf %253, %254 : vector<4x32xf32>
    %256 = vector.extract_strided_slice %246 {offsets = [0, 32], sizes = [4, 32], strides = [1, 1]} : vector<4x96xf32> to vector<4x32xf32>
    %257 = vector.extract_strided_slice %247 {offsets = [0, 32], sizes = [4, 32], strides = [1, 1]} : vector<4x96xf32> to vector<4x32xf32>
    %258 = arith.addf %256, %257 : vector<4x32xf32>
    %259 = arith.negf %258 : vector<4x32xf32>
    %260 = math.exp %259 : vector<4x32xf32>
    %cst_49 = arith.constant 1.000000e+00 : f32
    %261 = vector.broadcast %cst_49 : f32 to vector<4x32xf32>
    %262 = arith.addf %261, %260 : vector<4x32xf32>
    %263 = arith.divf %261, %262 : vector<4x32xf32>
    %264 = vector.extract_strided_slice %246 {offsets = [0, 64], sizes = [4, 32], strides = [1, 1]} : vector<4x96xf32> to vector<4x32xf32>
    %265 = vector.extract_strided_slice %247 {offsets = [0, 64], sizes = [4, 32], strides = [1, 1]} : vector<4x96xf32> to vector<4x32xf32>
    %266 = vector.broadcast %6 : vector<1x32xf32> to vector<4x32xf32>
    %267 = arith.addf %265, %266 : vector<4x32xf32>
    %268 = arith.mulf %255, %267 : vector<4x32xf32>
    %269 = arith.addf %264, %268 : vector<4x32xf32>
    %270 = math.tanh %269 : vector<4x32xf32>
    %271 = arith.subf %215, %270 : vector<4x32xf32>
    %272 = arith.mulf %263, %271 : vector<4x32xf32>
    %273 = arith.addf %270, %272 : vector<4x32xf32>
    %cst_50 = arith.constant dense<0.000000e+00> : vector<4x96xf32>
    %274 = tpu.matmul %273, %1, %cst_50 {dimension_numbers = #tpu.dot_dimension_numbers<[1], [0], [0], [1], [0, 0, 1, 1], [], []>} : vector<4x32xf32>, vector<32x96xf32>, vector<4x96xf32> -> vector<4x96xf32>
    %275 = vector.broadcast %5 : vector<1x96xf32> to vector<4x96xf32>
    %276 = arith.addf %274, %275 : vector<4x96xf32>
    %cst_51 = arith.constant dense<0.000000e+00> : vector<4x96xf32>
    %277 = tpu.matmul %245, %3, %cst_51 {dimension_numbers = #tpu.dot_dimension_numbers<[1], [0], [0], [1], [0, 0, 1, 1], [], []>} : vector<4x32xf32>, vector<32x96xf32>, vector<4x96xf32> -> vector<4x96xf32>
    %278 = vector.extract_strided_slice %276 {offsets = [0, 0], sizes = [4, 32], strides = [1, 1]} : vector<4x96xf32> to vector<4x32xf32>
    %279 = vector.extract_strided_slice %277 {offsets = [0, 0], sizes = [4, 32], strides = [1, 1]} : vector<4x96xf32> to vector<4x32xf32>
    %280 = arith.addf %278, %279 : vector<4x32xf32>
    %281 = arith.negf %280 : vector<4x32xf32>
    %282 = math.exp %281 : vector<4x32xf32>
    %cst_52 = arith.constant 1.000000e+00 : f32
    %283 = vector.broadcast %cst_52 : f32 to vector<4x32xf32>
    %284 = arith.addf %283, %282 : vector<4x32xf32>
    %285 = arith.divf %283, %284 : vector<4x32xf32>
    %286 = vector.extract_strided_slice %276 {offsets = [0, 32], sizes = [4, 32], strides = [1, 1]} : vector<4x96xf32> to vector<4x32xf32>
    %287 = vector.extract_strided_slice %277 {offsets = [0, 32], sizes = [4, 32], strides = [1, 1]} : vector<4x96xf32> to vector<4x32xf32>
    %288 = arith.addf %286, %287 : vector<4x32xf32>
    %289 = arith.negf %288 : vector<4x32xf32>
    %290 = math.exp %289 : vector<4x32xf32>
    %cst_53 = arith.constant 1.000000e+00 : f32
    %291 = vector.broadcast %cst_53 : f32 to vector<4x32xf32>
    %292 = arith.addf %291, %290 : vector<4x32xf32>
    %293 = arith.divf %291, %292 : vector<4x32xf32>
    %294 = vector.extract_strided_slice %276 {offsets = [0, 64], sizes = [4, 32], strides = [1, 1]} : vector<4x96xf32> to vector<4x32xf32>
    %295 = vector.extract_strided_slice %277 {offsets = [0, 64], sizes = [4, 32], strides = [1, 1]} : vector<4x96xf32> to vector<4x32xf32>
    %296 = vector.broadcast %7 : vector<1x32xf32> to vector<4x32xf32>
    %297 = arith.addf %295, %296 : vector<4x32xf32>
    %298 = arith.mulf %285, %297 : vector<4x32xf32>
    %299 = arith.addf %294, %298 : vector<4x32xf32>
    %300 = math.tanh %299 : vector<4x32xf32>
    %301 = arith.subf %245, %300 : vector<4x32xf32>
    %302 = arith.mulf %293, %301 : vector<4x32xf32>
    %303 = arith.addf %300, %302 : vector<4x32xf32>
    %304 = vector.extract_strided_slice %11 {offsets = [20, 0], sizes = [4, 96], strides = [1, 1]} : vector<32x96xf32> to vector<4x96xf32>
    %cst_54 = arith.constant dense<0.000000e+00> : vector<4x96xf32>
    %305 = tpu.matmul %273, %2, %cst_54 {dimension_numbers = #tpu.dot_dimension_numbers<[1], [0], [0], [1], [0, 0, 1, 1], [], []>} : vector<4x32xf32>, vector<32x96xf32>, vector<4x96xf32> -> vector<4x96xf32>
    %306 = vector.extract_strided_slice %304 {offsets = [0, 0], sizes = [4, 32], strides = [1, 1]} : vector<4x96xf32> to vector<4x32xf32>
    %307 = vector.extract_strided_slice %305 {offsets = [0, 0], sizes = [4, 32], strides = [1, 1]} : vector<4x96xf32> to vector<4x32xf32>
    %308 = arith.addf %306, %307 : vector<4x32xf32>
    %309 = arith.negf %308 : vector<4x32xf32>
    %310 = math.exp %309 : vector<4x32xf32>
    %cst_55 = arith.constant 1.000000e+00 : f32
    %311 = vector.broadcast %cst_55 : f32 to vector<4x32xf32>
    %312 = arith.addf %311, %310 : vector<4x32xf32>
    %313 = arith.divf %311, %312 : vector<4x32xf32>
    %314 = vector.extract_strided_slice %304 {offsets = [0, 32], sizes = [4, 32], strides = [1, 1]} : vector<4x96xf32> to vector<4x32xf32>
    %315 = vector.extract_strided_slice %305 {offsets = [0, 32], sizes = [4, 32], strides = [1, 1]} : vector<4x96xf32> to vector<4x32xf32>
    %316 = arith.addf %314, %315 : vector<4x32xf32>
    %317 = arith.negf %316 : vector<4x32xf32>
    %318 = math.exp %317 : vector<4x32xf32>
    %cst_56 = arith.constant 1.000000e+00 : f32
    %319 = vector.broadcast %cst_56 : f32 to vector<4x32xf32>
    %320 = arith.addf %319, %318 : vector<4x32xf32>
    %321 = arith.divf %319, %320 : vector<4x32xf32>
    %322 = vector.extract_strided_slice %304 {offsets = [0, 64], sizes = [4, 32], strides = [1, 1]} : vector<4x96xf32> to vector<4x32xf32>
    %323 = vector.extract_strided_slice %305 {offsets = [0, 64], sizes = [4, 32], strides = [1, 1]} : vector<4x96xf32> to vector<4x32xf32>
    %324 = vector.broadcast %6 : vector<1x32xf32> to vector<4x32xf32>
    %325 = arith.addf %323, %324 : vector<4x32xf32>
    %326 = arith.mulf %313, %325 : vector<4x32xf32>
    %327 = arith.addf %322, %326 : vector<4x32xf32>
    %328 = math.tanh %327 : vector<4x32xf32>
    %329 = arith.subf %273, %328 : vector<4x32xf32>
    %330 = arith.mulf %321, %329 : vector<4x32xf32>
    %331 = arith.addf %328, %330 : vector<4x32xf32>
    %cst_57 = arith.constant dense<0.000000e+00> : vector<4x96xf32>
    %332 = tpu.matmul %331, %1, %cst_57 {dimension_numbers = #tpu.dot_dimension_numbers<[1], [0], [0], [1], [0, 0, 1, 1], [], []>} : vector<4x32xf32>, vector<32x96xf32>, vector<4x96xf32> -> vector<4x96xf32>
    %333 = vector.broadcast %5 : vector<1x96xf32> to vector<4x96xf32>
    %334 = arith.addf %332, %333 : vector<4x96xf32>
    %cst_58 = arith.constant dense<0.000000e+00> : vector<4x96xf32>
    %335 = tpu.matmul %303, %3, %cst_58 {dimension_numbers = #tpu.dot_dimension_numbers<[1], [0], [0], [1], [0, 0, 1, 1], [], []>} : vector<4x32xf32>, vector<32x96xf32>, vector<4x96xf32> -> vector<4x96xf32>
    %336 = vector.extract_strided_slice %334 {offsets = [0, 0], sizes = [4, 32], strides = [1, 1]} : vector<4x96xf32> to vector<4x32xf32>
    %337 = vector.extract_strided_slice %335 {offsets = [0, 0], sizes = [4, 32], strides = [1, 1]} : vector<4x96xf32> to vector<4x32xf32>
    %338 = arith.addf %336, %337 : vector<4x32xf32>
    %339 = arith.negf %338 : vector<4x32xf32>
    %340 = math.exp %339 : vector<4x32xf32>
    %cst_59 = arith.constant 1.000000e+00 : f32
    %341 = vector.broadcast %cst_59 : f32 to vector<4x32xf32>
    %342 = arith.addf %341, %340 : vector<4x32xf32>
    %343 = arith.divf %341, %342 : vector<4x32xf32>
    %344 = vector.extract_strided_slice %334 {offsets = [0, 32], sizes = [4, 32], strides = [1, 1]} : vector<4x96xf32> to vector<4x32xf32>
    %345 = vector.extract_strided_slice %335 {offsets = [0, 32], sizes = [4, 32], strides = [1, 1]} : vector<4x96xf32> to vector<4x32xf32>
    %346 = arith.addf %344, %345 : vector<4x32xf32>
    %347 = arith.negf %346 : vector<4x32xf32>
    %348 = math.exp %347 : vector<4x32xf32>
    %cst_60 = arith.constant 1.000000e+00 : f32
    %349 = vector.broadcast %cst_60 : f32 to vector<4x32xf32>
    %350 = arith.addf %349, %348 : vector<4x32xf32>
    %351 = arith.divf %349, %350 : vector<4x32xf32>
    %352 = vector.extract_strided_slice %334 {offsets = [0, 64], sizes = [4, 32], strides = [1, 1]} : vector<4x96xf32> to vector<4x32xf32>
    %353 = vector.extract_strided_slice %335 {offsets = [0, 64], sizes = [4, 32], strides = [1, 1]} : vector<4x96xf32> to vector<4x32xf32>
    %354 = vector.broadcast %7 : vector<1x32xf32> to vector<4x32xf32>
    %355 = arith.addf %353, %354 : vector<4x32xf32>
    %356 = arith.mulf %343, %355 : vector<4x32xf32>
    %357 = arith.addf %352, %356 : vector<4x32xf32>
    %358 = math.tanh %357 : vector<4x32xf32>
    %359 = arith.subf %303, %358 : vector<4x32xf32>
    %360 = arith.mulf %351, %359 : vector<4x32xf32>
    %361 = arith.addf %358, %360 : vector<4x32xf32>
    %362 = vector.extract_strided_slice %11 {offsets = [24, 0], sizes = [4, 96], strides = [1, 1]} : vector<32x96xf32> to vector<4x96xf32>
    %cst_61 = arith.constant dense<0.000000e+00> : vector<4x96xf32>
    %363 = tpu.matmul %331, %2, %cst_61 {dimension_numbers = #tpu.dot_dimension_numbers<[1], [0], [0], [1], [0, 0, 1, 1], [], []>} : vector<4x32xf32>, vector<32x96xf32>, vector<4x96xf32> -> vector<4x96xf32>
    %364 = vector.extract_strided_slice %362 {offsets = [0, 0], sizes = [4, 32], strides = [1, 1]} : vector<4x96xf32> to vector<4x32xf32>
    %365 = vector.extract_strided_slice %363 {offsets = [0, 0], sizes = [4, 32], strides = [1, 1]} : vector<4x96xf32> to vector<4x32xf32>
    %366 = arith.addf %364, %365 : vector<4x32xf32>
    %367 = arith.negf %366 : vector<4x32xf32>
    %368 = math.exp %367 : vector<4x32xf32>
    %cst_62 = arith.constant 1.000000e+00 : f32
    %369 = vector.broadcast %cst_62 : f32 to vector<4x32xf32>
    %370 = arith.addf %369, %368 : vector<4x32xf32>
    %371 = arith.divf %369, %370 : vector<4x32xf32>
    %372 = vector.extract_strided_slice %362 {offsets = [0, 32], sizes = [4, 32], strides = [1, 1]} : vector<4x96xf32> to vector<4x32xf32>
    %373 = vector.extract_strided_slice %363 {offsets = [0, 32], sizes = [4, 32], strides = [1, 1]} : vector<4x96xf32> to vector<4x32xf32>
    %374 = arith.addf %372, %373 : vector<4x32xf32>
    %375 = arith.negf %374 : vector<4x32xf32>
    %376 = math.exp %375 : vector<4x32xf32>
    %cst_63 = arith.constant 1.000000e+00 : f32
    %377 = vector.broadcast %cst_63 : f32 to vector<4x32xf32>
    %378 = arith.addf %377, %376 : vector<4x32xf32>
    %379 = arith.divf %377, %378 : vector<4x32xf32>
    %380 = vector.extract_strided_slice %362 {offsets = [0, 64], sizes = [4, 32], strides = [1, 1]} : vector<4x96xf32> to vector<4x32xf32>
    %381 = vector.extract_strided_slice %363 {offsets = [0, 64], sizes = [4, 32], strides = [1, 1]} : vector<4x96xf32> to vector<4x32xf32>
    %382 = vector.broadcast %6 : vector<1x32xf32> to vector<4x32xf32>
    %383 = arith.addf %381, %382 : vector<4x32xf32>
    %384 = arith.mulf %371, %383 : vector<4x32xf32>
    %385 = arith.addf %380, %384 : vector<4x32xf32>
    %386 = math.tanh %385 : vector<4x32xf32>
    %387 = arith.subf %331, %386 : vector<4x32xf32>
    %388 = arith.mulf %379, %387 : vector<4x32xf32>
    %389 = arith.addf %386, %388 : vector<4x32xf32>
    %cst_64 = arith.constant dense<0.000000e+00> : vector<4x96xf32>
    %390 = tpu.matmul %389, %1, %cst_64 {dimension_numbers = #tpu.dot_dimension_numbers<[1], [0], [0], [1], [0, 0, 1, 1], [], []>} : vector<4x32xf32>, vector<32x96xf32>, vector<4x96xf32> -> vector<4x96xf32>
    %391 = vector.broadcast %5 : vector<1x96xf32> to vector<4x96xf32>
    %392 = arith.addf %390, %391 : vector<4x96xf32>
    %cst_65 = arith.constant dense<0.000000e+00> : vector<4x96xf32>
    %393 = tpu.matmul %361, %3, %cst_65 {dimension_numbers = #tpu.dot_dimension_numbers<[1], [0], [0], [1], [0, 0, 1, 1], [], []>} : vector<4x32xf32>, vector<32x96xf32>, vector<4x96xf32> -> vector<4x96xf32>
    %394 = vector.extract_strided_slice %392 {offsets = [0, 0], sizes = [4, 32], strides = [1, 1]} : vector<4x96xf32> to vector<4x32xf32>
    %395 = vector.extract_strided_slice %393 {offsets = [0, 0], sizes = [4, 32], strides = [1, 1]} : vector<4x96xf32> to vector<4x32xf32>
    %396 = arith.addf %394, %395 : vector<4x32xf32>
    %397 = arith.negf %396 : vector<4x32xf32>
    %398 = math.exp %397 : vector<4x32xf32>
    %cst_66 = arith.constant 1.000000e+00 : f32
    %399 = vector.broadcast %cst_66 : f32 to vector<4x32xf32>
    %400 = arith.addf %399, %398 : vector<4x32xf32>
    %401 = arith.divf %399, %400 : vector<4x32xf32>
    %402 = vector.extract_strided_slice %392 {offsets = [0, 32], sizes = [4, 32], strides = [1, 1]} : vector<4x96xf32> to vector<4x32xf32>
    %403 = vector.extract_strided_slice %393 {offsets = [0, 32], sizes = [4, 32], strides = [1, 1]} : vector<4x96xf32> to vector<4x32xf32>
    %404 = arith.addf %402, %403 : vector<4x32xf32>
    %405 = arith.negf %404 : vector<4x32xf32>
    %406 = math.exp %405 : vector<4x32xf32>
    %cst_67 = arith.constant 1.000000e+00 : f32
    %407 = vector.broadcast %cst_67 : f32 to vector<4x32xf32>
    %408 = arith.addf %407, %406 : vector<4x32xf32>
    %409 = arith.divf %407, %408 : vector<4x32xf32>
    %410 = vector.extract_strided_slice %392 {offsets = [0, 64], sizes = [4, 32], strides = [1, 1]} : vector<4x96xf32> to vector<4x32xf32>
    %411 = vector.extract_strided_slice %393 {offsets = [0, 64], sizes = [4, 32], strides = [1, 1]} : vector<4x96xf32> to vector<4x32xf32>
    %412 = vector.broadcast %7 : vector<1x32xf32> to vector<4x32xf32>
    %413 = arith.addf %411, %412 : vector<4x32xf32>
    %414 = arith.mulf %401, %413 : vector<4x32xf32>
    %415 = arith.addf %410, %414 : vector<4x32xf32>
    %416 = math.tanh %415 : vector<4x32xf32>
    %417 = arith.subf %361, %416 : vector<4x32xf32>
    %418 = arith.mulf %409, %417 : vector<4x32xf32>
    %419 = arith.addf %416, %418 : vector<4x32xf32>
    %420 = vector.extract_strided_slice %11 {offsets = [28, 0], sizes = [4, 96], strides = [1, 1]} : vector<32x96xf32> to vector<4x96xf32>
    %cst_68 = arith.constant dense<0.000000e+00> : vector<4x96xf32>
    %421 = tpu.matmul %389, %2, %cst_68 {dimension_numbers = #tpu.dot_dimension_numbers<[1], [0], [0], [1], [0, 0, 1, 1], [], []>} : vector<4x32xf32>, vector<32x96xf32>, vector<4x96xf32> -> vector<4x96xf32>
    %422 = vector.extract_strided_slice %420 {offsets = [0, 0], sizes = [4, 32], strides = [1, 1]} : vector<4x96xf32> to vector<4x32xf32>
    %423 = vector.extract_strided_slice %421 {offsets = [0, 0], sizes = [4, 32], strides = [1, 1]} : vector<4x96xf32> to vector<4x32xf32>
    %424 = arith.addf %422, %423 : vector<4x32xf32>
    %425 = arith.negf %424 : vector<4x32xf32>
    %426 = math.exp %425 : vector<4x32xf32>
    %cst_69 = arith.constant 1.000000e+00 : f32
    %427 = vector.broadcast %cst_69 : f32 to vector<4x32xf32>
    %428 = arith.addf %427, %426 : vector<4x32xf32>
    %429 = arith.divf %427, %428 : vector<4x32xf32>
    %430 = vector.extract_strided_slice %420 {offsets = [0, 32], sizes = [4, 32], strides = [1, 1]} : vector<4x96xf32> to vector<4x32xf32>
    %431 = vector.extract_strided_slice %421 {offsets = [0, 32], sizes = [4, 32], strides = [1, 1]} : vector<4x96xf32> to vector<4x32xf32>
    %432 = arith.addf %430, %431 : vector<4x32xf32>
    %433 = arith.negf %432 : vector<4x32xf32>
    %434 = math.exp %433 : vector<4x32xf32>
    %cst_70 = arith.constant 1.000000e+00 : f32
    %435 = vector.broadcast %cst_70 : f32 to vector<4x32xf32>
    %436 = arith.addf %435, %434 : vector<4x32xf32>
    %437 = arith.divf %435, %436 : vector<4x32xf32>
    %438 = vector.extract_strided_slice %420 {offsets = [0, 64], sizes = [4, 32], strides = [1, 1]} : vector<4x96xf32> to vector<4x32xf32>
    %439 = vector.extract_strided_slice %421 {offsets = [0, 64], sizes = [4, 32], strides = [1, 1]} : vector<4x96xf32> to vector<4x32xf32>
    %440 = vector.broadcast %6 : vector<1x32xf32> to vector<4x32xf32>
    %441 = arith.addf %439, %440 : vector<4x32xf32>
    %442 = arith.mulf %429, %441 : vector<4x32xf32>
    %443 = arith.addf %438, %442 : vector<4x32xf32>
    %444 = math.tanh %443 : vector<4x32xf32>
    %445 = arith.subf %389, %444 : vector<4x32xf32>
    %446 = arith.mulf %437, %445 : vector<4x32xf32>
    %447 = arith.addf %444, %446 : vector<4x32xf32>
    %cst_71 = arith.constant dense<0.000000e+00> : vector<4x96xf32>
    %448 = tpu.matmul %447, %1, %cst_71 {dimension_numbers = #tpu.dot_dimension_numbers<[1], [0], [0], [1], [0, 0, 1, 1], [], []>} : vector<4x32xf32>, vector<32x96xf32>, vector<4x96xf32> -> vector<4x96xf32>
    %449 = vector.broadcast %5 : vector<1x96xf32> to vector<4x96xf32>
    %450 = arith.addf %448, %449 : vector<4x96xf32>
    %cst_72 = arith.constant dense<0.000000e+00> : vector<4x96xf32>
    %451 = tpu.matmul %419, %3, %cst_72 {dimension_numbers = #tpu.dot_dimension_numbers<[1], [0], [0], [1], [0, 0, 1, 1], [], []>} : vector<4x32xf32>, vector<32x96xf32>, vector<4x96xf32> -> vector<4x96xf32>
    %452 = vector.extract_strided_slice %450 {offsets = [0, 0], sizes = [4, 32], strides = [1, 1]} : vector<4x96xf32> to vector<4x32xf32>
    %453 = vector.extract_strided_slice %451 {offsets = [0, 0], sizes = [4, 32], strides = [1, 1]} : vector<4x96xf32> to vector<4x32xf32>
    %454 = arith.addf %452, %453 : vector<4x32xf32>
    %455 = arith.negf %454 : vector<4x32xf32>
    %456 = math.exp %455 : vector<4x32xf32>
    %cst_73 = arith.constant 1.000000e+00 : f32
    %457 = vector.broadcast %cst_73 : f32 to vector<4x32xf32>
    %458 = arith.addf %457, %456 : vector<4x32xf32>
    %459 = arith.divf %457, %458 : vector<4x32xf32>
    %460 = vector.extract_strided_slice %450 {offsets = [0, 32], sizes = [4, 32], strides = [1, 1]} : vector<4x96xf32> to vector<4x32xf32>
    %461 = vector.extract_strided_slice %451 {offsets = [0, 32], sizes = [4, 32], strides = [1, 1]} : vector<4x96xf32> to vector<4x32xf32>
    %462 = arith.addf %460, %461 : vector<4x32xf32>
    %463 = arith.negf %462 : vector<4x32xf32>
    %464 = math.exp %463 : vector<4x32xf32>
    %cst_74 = arith.constant 1.000000e+00 : f32
    %465 = vector.broadcast %cst_74 : f32 to vector<4x32xf32>
    %466 = arith.addf %465, %464 : vector<4x32xf32>
    %467 = arith.divf %465, %466 : vector<4x32xf32>
    %468 = vector.extract_strided_slice %450 {offsets = [0, 64], sizes = [4, 32], strides = [1, 1]} : vector<4x96xf32> to vector<4x32xf32>
    %469 = vector.extract_strided_slice %451 {offsets = [0, 64], sizes = [4, 32], strides = [1, 1]} : vector<4x96xf32> to vector<4x32xf32>
    %470 = vector.broadcast %7 : vector<1x32xf32> to vector<4x32xf32>
    %471 = arith.addf %469, %470 : vector<4x32xf32>
    %472 = arith.mulf %459, %471 : vector<4x32xf32>
    %473 = arith.addf %468, %472 : vector<4x32xf32>
    %474 = math.tanh %473 : vector<4x32xf32>
    %475 = arith.subf %419, %474 : vector<4x32xf32>
    %476 = arith.mulf %467, %475 : vector<4x32xf32>
    %477 = arith.addf %474, %476 : vector<4x32xf32>
    %c0_75 = arith.constant 0 : index
    %c0_76 = arith.constant 0 : index
    %478 = vector.load %arg9[%c0_75, %c0_76] : memref<1x32xf32, #tpu.memory_space<vmem>>, vector<1x32xf32>
    %479 = vector.broadcast %478 : vector<1x32xf32> to vector<4x32xf32>
    %480 = arith.mulf %477, %479 : vector<4x32xf32>
    %cst_77 = arith.constant dense<0.000000e+00> : vector<4xf32>
    %481 = vector.multi_reduction <add>, %480, %cst_77 [1] : vector<4x32xf32> to vector<4xf32>
    %482 = vector.shape_cast %481 : vector<4xf32> to vector<4x1xf32>
    %c0_78 = arith.constant 0 : index
    %c0_79 = arith.constant 0 : index
    %483 = vector.load %arg10[%c0_78, %c0_79] : memref<1x1xf32, #tpu.memory_space<vmem>>, vector<1x1xf32>
    %484 = vector.broadcast %483 : vector<1x1xf32> to vector<4x1xf32>
    %485 = arith.addf %482, %484 : vector<4x1xf32>
    %c0_80 = arith.constant 0 : index
    %c0_81 = arith.constant 0 : index
    %486 = vector.load %arg11[%c0_80, %c0_81] : memref<4x1xf32, #tpu.memory_space<vmem>>, vector<4x1xf32>
    tpu.vector_store %arg11[%c0_80, %c0_81], %485 {strides = array<i32>} : memref<4x1xf32, #tpu.memory_space<vmem>>, vector<4x1xf32>,
    return
  }
}

</mosaic_0001>

<bundles_post_ra>
// kernel: gru_forward.1
= control target key start
LH: loop header
LB: loop body
LE: loop exit
PB: predicated region body
PF: predicated region fallthrough
CT: control target
= control target key end

     0   :  { %s3818_s0 = inlined_call_operand.vmem [shape: f32[32,8], index: 0, kind: input, shape index: {}]   ;;  %s3819_s1 = inlined_call_operand.hbm [shape: f32[8,96], index: 1, kind: input, shape index: {}]   ;;  %s3820_s2 = inlined_call_operand.vmem [shape: f32[32,96], index: 2, kind: input, shape index: {}]   ;;  %s3821_s3 = inlined_call_operand.vmem [shape: f32[1,96], index: 3, kind: input, shape index: {}]   ;;  %s3822_s4 = inlined_call_operand.vmem [shape: f32[1,32], index: 4, kind: input, shape index: {}]   ;;  %s3823_s5 = inlined_call_operand.vmem [shape: f32[32,96], index: 5, kind: input, shape index: {}]   ;;  %s3824_s6 = inlined_call_operand.vmem [shape: f32[32,96], index: 6, kind: input, shape index: {}]   ;;  %s3825_s7 = inlined_call_operand.vmem [shape: f32[1,96], index: 7, kind: input, shape index: {}]   ;;  %s3826_s8 = inlined_call_operand.vmem [shape: f32[1,32], index: 8, kind: input, shape index: {}]   ;;  %s3827_s9 = inlined_call_operand.hbm [shape: f32[1,32], index: 9, kind: input, shape index: {}]   ;;  %s3828_s10 = inlined_call_operand.<no memory space> [shape: f32[1,1], index: 10, kind: input, shape index: {}]   ;;  %s3829_s11 = inlined_call_operand.vmem [shape: f32[4,1], index: 11, kind: output, shape index: {}]  }
   0x1   :  { %v16_v0 = vstv %s3828_s10 }
   0x2   :  { %17 = vst [vmem:[#allocation2] sm:$0x1] %v16_v0 }
   0x3   :  { %18 = vsyncpa [#allocation4], 0 }
   0x4   :  { %19 = vsyncpa [#allocation6], 0  ;;  %s3274_s19 = smov [#allocation3]   ;;  %s3275_s21 = smov [#allocation5]  }
   0x5   :  { %s28_s20 = sshll.u32 %s3274_s19, 4  ;;  %s52_s22 = sshll.u32 %s3275_s21, 4  ;;  %s29_s20 = int_to_ptr.vmem [resolvable:$true] %s28_s20  ;;  %s53_s22 = int_to_ptr.vmem [resolvable:$true] %s52_s22 }
   0x6   :  { %s3226_s25 = scalar_lea.hbm %s3819_s1, 128 }
   0x7   :  { %p3227_p0 = scmp.ne.s32.totalorder %s3819_s1, %s3226_s25  ;;  %p3230_p1 = scmp.lt.u32.totalorder %s3226_s25, %s3819_s1 }
   0x9   :  { %p3232_p2 = pnand %p3230_p1, %p3227_p0 }
   0xb   :  { %3235 = shalt.err (!%p3232_p2)
}
   0xc   :  { %s3236_s10 = scalar_lea.vmem %s29_s20, 128  ;;  %p3241_p4 = scmp.lt.s32.totalorder %s29_s20, %s29_s20 }
   0xd   :  { %p3237_p3 = scmp.ne.s32.totalorder %s29_s20, %s3236_s10  ;;  %p3242_p5 = scmp.lt.s32.totalorder %s3236_s10, %s3236_s10 }
   0xf   :  { %p3243_p6 = por %p3242_p5, %p3241_p4 }
  0x11   :  { %p3244_p7 = pnand %p3243_p6, %p3237_p3 }
  0x13   :  { %3247 = shalt.err (!%p3244_p7)
}
  0x14   :  { %31 = dma.hbm_to_vmem [thread:$0]  %s3819_s1, 128, %s29_s20, [#allocation4]  }
  0x15   :  { %s3248_s15 = scalar_lea.hbm %s3827_s9, 16 }
  0x16   :  { %p3249_p8 = scmp.ne.s32.totalorder %s3827_s9, %s3248_s15  ;;  %p3252_p9 = scmp.lt.u32.totalorder %s3248_s15, %s3827_s9 }
  0x18   :  { %p3254_p10 = pnand %p3252_p9, %p3249_p8 }
  0x1a   :  { %3257 = shalt.err (!%p3254_p10)
}
  0x1b   :  { %s3258_s21 = scalar_lea.vmem %s53_s22, 16  ;;  %s3262_s23 = scalar_lea.vmem %s53_s22, 32 }
  0x1c   :  { %p3259_p11 = scmp.ne.s32.totalorder %s53_s22, %s3258_s21  ;;  %p3263_p12 = scmp.lt.s32.totalorder %s53_s22, %s53_s22 }
  0x1d   :  { %p3264_p13 = scmp.lt.s32.totalorder %s3262_s23, %s3258_s21 }
  0x1f   :  { %p3265_p0 = por %p3264_p13, %p3263_p12 }
  0x21   :  { %p3266_p1 = pnand %p3265_p0, %p3259_p11 }
  0x23   :  { %3269 = shalt.err (!%p3266_p1)
}
  0x24   :  { %55 = dma.hbm_to_vmem [thread:$0]  %s3827_s9, 16, %s53_s22, [#allocation6]  }
  0x25   :  { %3270 = dma.done.wait [#allocation4], 128  }
  0x26   :  { %3271 = vsyncadd [#allocation4], 4294967168 }
  0x27   :  { %3272 = dma.done.wait [#allocation6], 16  }
  0x28   :  { %3273 = vsyncadd [#allocation6], 4294967280  ;;  %v3276_v1 = vmov 0.0|0.0   ;;  %vm3277_vm0 = vmmov 0   ;;  %v3278_v2 = vmov 0.0   ;;  %vm91_vm1 = vcmask 64512  }
  0x29   :  { %2977 = vmatprep.subr.bf16.mxu1 %v3276_v1  ;;  %2721 = vmatprep.mubr.msk.f32.mxu1 %vm3277_vm0, %v3278_v2  ;;  %v69_v3 = vld [vmem:[%s3820_s2] sm:$0xff]  ;;  %v70_v4 = vld [vmem:[%s3820_s2 + $0x8] sm:$0xff]  ;;  %v71_v9 = vld [vmem:[%s3820_s2 + $0x10] sm:$0xff]  ;;  %s3279_s16 = smov 64   ;;  %vm189_vm2 = vcmask 261120   ;;  %vm2512_vm3 = vcmask 257024  }
  0x2a   :  { %v64_v5 = vld [vmem:[#allocation3] sm:$0xff]  ;;  %v3378_v6 = vpack.c.bf16 %v70_v4, %v69_v3  ;;  %v72_v10 = vld [vmem:[%s3820_s2 + $0x18] sm:$0xff]  ;;  %v2538_v11 = vld [vmem:[%s3822_s4] ss:$0 sm:$0xff]  ;;  %vm2524_vm4 = vcmask 3072  }
  0x2b   :  { %2705 = vmatprep.subr.mxu0 %v64_v5  ;;  %v81_v7 = vld [vmem:[%s3818_s0] sm:$0xff]  ;;  %v82_v8 = vld [vmem:[%s3818_s0 + $0x8] sm:$0xff]  ;;  %v3398_v12 = vpack.c.bf16 %v72_v10, %v71_v9  ;;  %275 = vrot.lane.b32.xlu0 %v2538_v11, %s3279_s16  ;;  %v75_v34 = vld [vmem:[%s3824_s6 + $0x10] sm:$0xff] }
  0x2c   :  { %2706 = vmatpush3.msra.mxu0 %v64_v5  ;;  %2707 = vmatprep.mubr.msk.f32.mxu0 %vm91_vm1, %v81_v7  ;;  %v3417_v19 = vld [vmem:[%s3821_s3] ss:$0 sm:$0xff]  ;;  %s3280_s3 = smov 96   ;;  %v74_v33 = vld [vmem:[%s3824_s6 + $0x8] sm:$0xff]  ;;  %v76_v36 = vld [vmem:[%s3824_s6 + $0x18] sm:$0xff] }
  0x2d   :  { %2979 = vmatpush3.bf16.msra.mxu1 %v3378_v6  ;;  %2708 = vmatmul.mubr.msk.f32.vlgmr.msra.gmra.mrb[0].mxu0 %vm91_vm1, %v82_v8  ;;  %v73_v32 = vld [vmem:[%s3824_s6] sm:$0xff]  ;;  %v66_v38 = vld [vmem:[%s3823_s5 + $0x8] sm:$0xff]  ;;  %v83_v40 = vld [vmem:[%s3818_s0 + $0x10] sm:$0xff]  ;;  %v3458_v43 = vpack.c.bf16 %v76_v36, %v75_v34 }
  0x2e   :  { %2980 = vmatprep.subr.bf16.mxu1 %v3276_v1  ;;  %2983 = vmatprep.subr.bf16.mxu0 %v3276_v1  ;;  %v3435_v35 = vpack.c.bf16 %v74_v33, %v73_v32  ;;  %v65_v37 = vld [vmem:[%s3823_s5] sm:$0xff]  ;;  %v84_v41 = vld [vmem:[%s3818_s0 + $0x18] sm:$0xff]  ;;  %v67_v42 = vld [vmem:[%s3823_s5 + $0x10] sm:$0xff]  ;;  %s3281_s0 = smov 32  }
  0x2f   :  { %v3446_v39 = vpack.c.bf16 %v66_v38, %v65_v37  ;;  %2710 = vmatprep.mubr.msk.f32.mxu0 %vm91_vm1, %v83_v40  ;;  %v68_v44 = vld [vmem:[%s3823_s5 + $0x18] sm:$0xff]  ;;  %v2542_v48 = vld [vmem:[%s3826_s8] ss:$0 sm:$0xff] }
  0x30   :  { %v3466_v45 = vpack.c.bf16 %v68_v44, %v67_v42  ;;  %v3517_v58 = vld [vmem:[%s3825_s7] ss:$0 sm:$0xff] }
  0x31   :  { %2982 = vmatpush3.bf16.msra.mxu1 %v3398_v12  ;;  %2985 = vmatpush3.bf16.msra.mxu0 %v3446_v39 }
  0x32   :  { %2989 = vmatprep.subr.bf16.mxu1 %v3276_v1  ;;  %2711 = vmatmul.mubr.msk.f32.gmra.mrb[2].mxu0 %vm91_vm1, %v84_v41 }
  0x33   :  { %2986 = vmatprep.subr.bf16.mxu0 %v3276_v1  ;;  %2732 = vmatprep.mubr.msk.f32.mxu0 %vm3277_vm0, %v3278_v2 }
  0x34   :  { %2722 = vmatmul.mubr.f32.vlgmr.msra.gmra.mrb[0].mxu1 %v3278_v2 }
  0x35   :  { %2743 = vmatprep.mubr.msk.f32.mxu1 %vm3277_vm0, %v3278_v2  ;;  %2991 = vmatpush3.bf16.msra.mxu1 %v3435_v35 }
  0x36   :  { %2992 = vmatprep.subr.bf16.mxu1 %v3276_v1  ;;  %2988 = vmatpush3.bf16.msra.mxu0 %v3466_v45 }
  0x37   :  { %2995 = vmatprep.subr.bf16.mxu0 %v3276_v1 }
  0x39   :  { %2994 = vmatpush3.bf16.msra.mxu1 %v3458_v43 }
  0x3a   :  { %3001 = vmatprep.subr.bf16.mxu1 %v3276_v1 }
  0x3c   :  { %2744 = vmatmul.mubr.f32.vlgmr.msra.gmra.mrb[2].mxu1 %v3278_v2 }
  0x3d   :  { %3003 = vmatpush3.bf16.msra.mxu1 %v3446_v39  ;;  %2765 = vmatprep.mubr.msk.f32.mxu1 %vm3277_vm0, %v3278_v2 }
  0x3e   :  { %3004 = vmatprep.subr.bf16.mxu1 %v3276_v1 }
  0x41   :  { %3006 = vmatpush3.bf16.msra.mxu1 %v3466_v45 }
  0x42   :  { %3013 = vmatprep.subr.bf16.mxu1 %v3276_v1 }
  0x9d   :  { %v3410_v15 = vpop.permute.xlu0 %275 }
 0x100   :  { %v3408_v13 = vpop.f32.mrb[0].mxu0 }
 0x101   :  { %v170_v14 = vpop.f32.mrb[1].mxu0 }
 0x102   :  { %v3420_v20 = vadd.f32 %v3417_v19, %v170_v14 }
 0x105   :  { %v3492_v51 = vpop.f32.mrb[2].mxu0 }
 0x106   :  { %v3494_v52 = vpop.f32.mrb[3].mxu0 }
 0x107   :  { %v259_v16 = vpop.f32.mrb[0].mxu1 }
 0x108   :  { %v278_v17 = vadd.f32 %v3410_v15, %v259_v16  ;;  %v2723_v18 = vpop.f32.mrb[1].mxu1  ;;  %v263_v21 = vadd.f32 %v259_v16, %v3420_v20 }
 0x10a   :  { %280 = vrot.lane.b32.xlu0 %v278_v17, %s3279_s16  ;;  %v2537_v22 = vmul.f32 -1.442695, %v263_v21 }
 0x10c   :  { %3129 = vpow2.f32 %v2537_v22 }
 0x10f   :  { %v448_v53 = vpop.f32.mrb[2].mxu1 }
 0x110   :  { %v2745_v54 = vpop.f32.mrb[3].mxu1 }
 0x116   :  { %v3130_v23 = vpop.eup %3129 }
 0x117   :  { %v267_v24 = vadd.f32 1.0, %v3130_v23 }
 0x119   :  { %3131 = vrcp.f32 %v267_v24 }
 0x123   :  { %v3132_v25 = vpop.eup %3131 }
 0x17c   :  { %v281_v26 = vpop.permute.xlu0 %280 }
 0x17d   :  { %v283_v27 = vmul.f32 %v3132_v25, %v281_v26 }
 0x17f   :  { %285 = vrot.lane.b32.xlu1 %v283_v27, %s3279_s16 }
 0x1f1   :  { %v286_v28 = vpop.permute.xlu1 %285 }
 0x1f2   :  { %v288_v29 = vadd.f32 %v286_v28, %v3420_v20 }
 0x1f4   :  { %3133 = vtanh.f32 %v288_v29 }
 0x1fe   :  { %v3134_v30 = vpop.eup %3133 }
 0x1ff   :  { %v290_v31 = vsub.f32 0.0, %v3134_v30 }
 0x201   :  { %292 = vrot.lane.b32.xlu1 %v290_v31, %s3280_s3 }
 0x273   :  { %v293_v46 = vpop.permute.xlu1 %292 }
 0x274   :  { %v295_v47 = vmul.f32 %v3132_v25, %v293_v46 }
 0x276   :  { %297 = vrot.lane.b32.xlu0 %v295_v47, %s3281_s0 }
 0x27a   :  { %464 = vrot.lane.b32.xlu0 %v2542_v48, %s3279_s16 }
 0x2e8   :  { %v298_v49 = vpop.permute.xlu0 %297 }
 0x2e9   :  { %v3488_v50 = vadd.f32 %v3134_v30, %v298_v49 }
 0x2eb   :  { %308 = vrot.lane.b32.xlu1 %v3488_v50, %s3279_s16 }
 0x2ec   :  { %v3496_v55 = vpop.permute.xlu0 %464 }
 0x2ed   :  { %v467_v56 = vadd.f32 %v3496_v55, %v448_v53 }
 0x2ef   :  { %469 = vrot.lane.b32.xlu0 %v467_v56, %s3279_s16 }
 0x35d   :  { %v309_v57 = vpop.permute.xlu1 %308 }
 0x35e   :  { %2733 = vmatmul.mubr.msk.f32.vlgmr.msra.gmra.mrb[4].mxu0 %vm189_vm2, %v309_v57 }
 0x35f   :  { %2997 = vmatpush3.bf16.msra.mxu0 %v3378_v6  ;;  %2754 = vmatprep.mubr.msk.f32.mxu0 %vm3277_vm0, %v3278_v2 }
 0x360   :  { %2998 = vmatprep.subr.bf16.mxu0 %v3276_v1 }
 0x361   :  { %v470_v9 = vpop.permute.xlu0 %469 }
 0x363   :  { %3000 = vmatpush3.bf16.msra.mxu0 %v3398_v12 }
 0x364   :  { %3007 = vmatprep.subr.bf16.mxu0 %v3276_v1 }
 0x366   :  { %2755 = vmatmul.mubr.msk.f32.vlgmr.msra.gmra.mrb[6].mxu0 %vm189_vm2, %v309_v57 }
 0x367   :  { %3009 = vmatpush3.bf16.msra.mxu0 %v3435_v35  ;;  %2776 = vmatprep.mubr.msk.f32.mxu0 %vm3277_vm0, %v3278_v2 }
 0x368   :  { %3010 = vmatprep.subr.bf16.mxu0 %v3276_v1 }
 0x36b   :  { %3012 = vmatpush3.bf16.msra.mxu0 %v3458_v43 }
 0x36c   :  { %3019 = vmatprep.subr.bf16.mxu0 %v3276_v1 }
 0x431   :  { %v378_v59 = vpop.f32.mrb[4].mxu0 }
 0x432   :  { %v379_v60 = vadd.f32 %v3517_v58, %v378_v59  ;;  %v2734_v61 = vpop.f32.mrb[5].mxu0 }
 0x434   :  { %v452_v62 = vadd.f32 %v448_v53, %v379_v60 }
 0x436   :  { %v2541_v63 = vmul.f32 -1.442695, %v452_v62 }
 0x438   :  { %3135 = vpow2.f32 %v2541_v63 }
 0x439   :  { %v556_v0 = vpop.f32.mrb[6].mxu0 }
 0x43a   :  { %v570_v3 = vadd.f32 %v556_v0, %v3410_v15  ;;  %v2756_v4 = vpop.f32.mrb[7].mxu0  ;;  %v561_v14 = vrot.slane %v556_v0, 4 }
 0x43c   :  { %v572_v5 = vrot.slane %v570_v3, 4  ;;  %v563_v16 = vadd.f32 %v561_v14, %v3420_v20 }
 0x43e   :  { %573 = vrot.lane.b32.xlu1 %v572_v5, %s3279_s16  ;;  %v2544_v17 = vmul.f32 -1.442695, %v563_v16 }
 0x442   :  { %v3136_v7 = vpop.eup %3135 }
 0x443   :  { %v456_v8 = vadd.f32 1.0, %v3136_v7 }
 0x445   :  { %3137 = vrcp.f32 %v456_v8  ;;  %v3568_v8 = vadd.f32 %v3408_v13, %v3417_v19 }
 0x446   :  { %3139 = vpow2.f32 %v2544_v17 }
 0x44f   :  { %v3138_v10 = vpop.eup %3137 }
 0x450   :  { %v472_v11 = vmul.f32 %v3138_v10, %v470_v9  ;;  %v3140_v18 = vpop.eup %3139 }
 0x451   :  { %v567_v21 = vadd.f32 1.0, %v3140_v18 }
 0x452   :  { %474 = vrot.lane.b32.xlu0 %v472_v11, %s3279_s16 }
 0x453   :  { %3141 = vrcp.f32 %v567_v21 }
 0x45d   :  { %v3142_v22 = vpop.eup %3141 }
 0x4b0   :  { %v574_v23 = vpop.permute.xlu1 %573 }
 0x4b1   :  { %v576_v24 = vmul.f32 %v3142_v22, %v574_v23 }
 0x4b3   :  { %578 = vrot.lane.b32.xlu1 %v576_v24, %s3279_s16 }
 0x4c4   :  { %v475_v25 = vpop.permute.xlu0 %474 }
 0x4c5   :  { %v477_v26 = vadd.f32 %v475_v25, %v379_v60 }
 0x4c7   :  { %3143 = vtanh.f32 %v477_v26 }
 0x4d1   :  { %v3144_v27 = vpop.eup %3143 }
 0x4d2   :  { %v479_v28 = vsub.f32 0.0, %v3144_v27 }
 0x4d4   :  { %481 = vrot.lane.b32.xlu0 %v479_v28, %s3280_s3 }
 0x525   :  { %v579_v29 = vpop.permute.xlu1 %578 }
 0x526   :  { %v581_v30 = vadd.f32 %v579_v29, %v3420_v20 }
 0x528   :  { %3145 = vtanh.f32 %v581_v30 }
 0x532   :  { %v3146_v31 = vpop.eup %3145 }
 0x533   :  { %v584_v32 = vrot.slane %v3146_v31, 4 }
 0x535   :  { %v586_v33 = vsub.f32 %v3488_v50, %v584_v32 }
 0x537   :  { %v588_v34 = vrot.slane %v586_v33, 4 }
 0x539   :  { %589 = vrot.lane.b32.xlu1 %v588_v34, %s3280_s3 }
 0x546   :  { %v482_v36 = vpop.permute.xlu0 %481 }
 0x547   :  { %v484_v37 = vmul.f32 %v3138_v10, %v482_v36 }
 0x549   :  { %486 = vrot.lane.b32.xlu0 %v484_v37, %s3281_s0 }
 0x5ab   :  { %v590_v38 = vpop.permute.xlu1 %589 }
 0x5ac   :  { %v592_v40 = vmul.f32 %v3142_v22, %v590_v38 }
 0x5ae   :  { %594 = vrot.lane.b32.xlu1 %v592_v40, %s3281_s0 }
 0x5bb   :  { %v487_v41 = vpop.permute.xlu0 %486 }
 0x5bc   :  { %v3531_v42 = vadd.f32 %v3144_v27, %v487_v41 }
 0x5be   :  { %675 = vrot.lane.b32.xlu0 %v3531_v42, %s3279_s16 }
 0x620   :  { %v595_v20 = vpop.permute.xlu1 %594 }
 0x621   :  { %v3535_v44 = vadd.f32 %v3146_v31, %v595_v20 }
 0x623   :  { %v599_v46 = vrot.slane %v3535_v44, 4 }
 0x625   :  { %600 = vrot.lane.b32.xlu1 %v599_v46, %s3279_s16 }
 0x630   :  { %v676_v47 = vpop.permute.xlu0 %675 }
 0x631   :  { %2777 = vmatmul.mubr.msk.f32.vlgmr.msra.gmra.mrb[8].mxu0 %vm189_vm2, %v676_v47 }
 0x632   :  { %3021 = vmatpush3.bf16.msra.mxu0 %v3446_v39  ;;  %2798 = vmatprep.mubr.msk.f32.mxu0 %vm3277_vm0, %v3278_v2 }
 0x633   :  { %3022 = vmatprep.subr.bf16.mxu0 %v3276_v1 }
 0x636   :  { %3024 = vmatpush3.bf16.msra.mxu0 %v3466_v45 }
 0x637   :  { %3031 = vmatprep.subr.bf16.mxu0 %v3276_v1 }
 0x697   :  { %v601_v48 = vpop.permute.xlu1 %600 }
 0x698   :  { %2766 = vmatmul.mubr.msk.f32.vlgmr.msra.gmra.mrb[4].mxu1 %vm189_vm2, %v601_v48 }
 0x699   :  { %3015 = vmatpush3.bf16.msra.mxu1 %v3378_v6  ;;  %2787 = vmatprep.mubr.msk.f32.mxu1 %vm3277_vm0, %v3278_v2 }
 0x69a   :  { %3016 = vmatprep.subr.bf16.mxu1 %v3276_v1 }
 0x69d   :  { %3018 = vmatpush3.bf16.msra.mxu1 %v3398_v12 }
 0x69e   :  { %3025 = vmatprep.subr.bf16.mxu1 %v3276_v1 }
 0x6a0   :  { %2788 = vmatmul.mubr.msk.f32.vlgmr.msra.gmra.mrb[6].mxu1 %vm189_vm2, %v601_v48 }
 0x6a1   :  { %3027 = vmatpush3.bf16.msra.mxu1 %v3435_v35  ;;  %2809 = vmatprep.mubr.msk.f32.mxu1 %vm3277_vm0, %v3278_v2 }
 0x6a2   :  { %3028 = vmatprep.subr.bf16.mxu1 %v3276_v1 }
 0x6a5   :  { %3030 = vmatpush3.bf16.msra.mxu1 %v3458_v43 }
 0x6a6   :  { %3037 = vmatprep.subr.bf16.mxu1 %v3276_v1 }
 0x704   :  { %v745_v49 = vpop.f32.mrb[8].mxu0 }
 0x705   :  { %v756_v50 = vadd.f32 %v745_v49, %v3496_v55  ;;  %v2778_v53 = vpop.f32.mrb[9].mxu0 }
 0x707   :  { %758 = vrot.lane.b32.xlu0 %v756_v50, %s3279_s16 }
 0x76b   :  { %v670_v54 = vpop.f32.mrb[4].mxu1 }
 0x76c   :  { %v671_v56 = vadd.f32 %v3517_v58, %v670_v54  ;;  %v2767_v57 = vpop.f32.mrb[5].mxu1 }
 0x76e   :  { %v749_v59 = vadd.f32 %v745_v49, %v671_v56 }
 0x770   :  { %v2547_v60 = vmul.f32 -1.442695, %v749_v59 }
 0x772   :  { %3147 = vpow2.f32 %v2547_v60 }
 0x773   :  { %v845_v61 = vpop.f32.mrb[6].mxu1 }
 0x774   :  { %v856_v62 = vadd.f32 %v845_v61, %v3410_v15  ;;  %v2789_v63 = vpop.f32.mrb[7].mxu1  ;;  %v849_v9 = vadd.f32 %v845_v61, %v3568_v8 }
 0x776   :  { %858 = vrot.lane.b32.xlu1 %v856_v62, %s3279_s16  ;;  %v2549_v10 = vmul.f32 -1.442695, %v849_v9 }
 0x779   :  { %v759_v5 = vpop.permute.xlu0 %758 }
 0x77c   :  { %v3148_v0 = vpop.eup %3147 }
 0x77d   :  { %v753_v3 = vadd.f32 1.0, %v3148_v0 }
 0x77f   :  { %3149 = vrcp.f32 %v753_v3 }
 0x780   :  { %3151 = vpow2.f32 %v2549_v10 }
 0x789   :  { %v3150_v4 = vpop.eup %3149 }
 0x78a   :  { %v761_v7 = vmul.f32 %v3150_v4, %v759_v5  ;;  %v3152_v11 = vpop.eup %3151 }
 0x78b   :  { %v853_v14 = vadd.f32 1.0, %v3152_v11 }
 0x78c   :  { %763 = vrot.lane.b32.xlu0 %v761_v7, %s3279_s16 }
 0x78d   :  { %3153 = vrcp.f32 %v853_v14 }
 0x797   :  { %v3154_v16 = vpop.eup %3153 }
 0x7e8   :  { %v859_v17 = vpop.permute.xlu1 %858 }
 0x7e9   :  { %v861_v18 = vmul.f32 %v3154_v16, %v859_v17 }
 0x7eb   :  { %863 = vrot.lane.b32.xlu1 %v861_v18, %s3279_s16 }
 0x7fe   :  { %v764_v21 = vpop.permute.xlu0 %763 }
 0x7ff   :  { %v766_v22 = vadd.f32 %v764_v21, %v671_v56 }
 0x801   :  { %3155 = vtanh.f32 %v766_v22 }
 0x80b   :  { %v3156_v23 = vpop.eup %3155 }
 0x80c   :  { %v768_v24 = vsub.f32 %v3531_v42, %v3156_v23 }
 0x80e   :  { %770 = vrot.lane.b32.xlu0 %v768_v24, %s3280_s3 }
 0x85d   :  { %v864_v13 = vpop.permute.xlu1 %863 }
 0x85e   :  { %v866_v25 = vadd.f32 %v864_v13, %v3568_v8 }
 0x860   :  { %3157 = vtanh.f32 %v866_v25 }
 0x86a   :  { %v3158_v26 = vpop.eup %3157 }
 0x86b   :  { %v869_v27 = vrot.slane %v3158_v26, 4 }
 0x86d   :  { %v871_v28 = vsub.f32 %v3535_v44, %v869_v27 }
 0x86f   :  { %v873_v29 = vrot.slane %v871_v28, 4 }
 0x871   :  { %874 = vrot.lane.b32.xlu1 %v873_v29, %s3280_s3 }
 0x880   :  { %v771_v30 = vpop.permute.xlu0 %770 }
 0x881   :  { %v773_v31 = vmul.f32 %v3150_v4, %v771_v30 }
 0x883   :  { %775 = vrot.lane.b32.xlu0 %v773_v31, %s3281_s0 }
 0x8e3   :  { %v875_v32 = vpop.permute.xlu1 %874 }
 0x8e4   :  { %v877_v33 = vmul.f32 %v3154_v16, %v875_v32 }
 0x8e6   :  { %879 = vrot.lane.b32.xlu1 %v877_v33, %s3281_s0 }
 0x8f5   :  { %v776_v34 = vpop.permute.xlu0 %775 }
 0x8f6   :  { %v3579_v36 = vadd.f32 %v3156_v23, %v776_v34 }
 0x8f8   :  { %959 = vrot.lane.b32.xlu0 %v3579_v36, %s3279_s16 }
 0x958   :  { %v880_v37 = vpop.permute.xlu1 %879 }
 0x959   :  { %v3583_v38 = vadd.f32 %v3158_v26, %v880_v37 }
 0x95b   :  { %884 = vrot.lane.b32.xlu1 %v3583_v38, %s3279_s16 }
 0x96a   :  { %v960_v40 = vpop.permute.xlu0 %959 }
 0x96b   :  { %2810 = vmatmul.mubr.msk.f32.vlgmr.msra.gmra.mrb[8].mxu1 %vm189_vm2, %v960_v40 }
 0x96c   :  { %3039 = vmatpush3.bf16.msra.mxu1 %v3446_v39  ;;  %2831 = vmatprep.mubr.msk.f32.mxu1 %vm3277_vm0, %v3278_v2 }
 0x96d   :  { %3040 = vmatprep.subr.bf16.mxu1 %v3276_v1 }
 0x970   :  { %3042 = vmatpush3.bf16.msra.mxu1 %v3466_v45 }
 0x971   :  { %3049 = vmatprep.subr.bf16.mxu1 %v3276_v1 }
 0x9cd   :  { %v885_v41 = vpop.permute.xlu1 %884 }
 0x9ce   :  { %2799 = vmatmul.mubr.msk.f32.vlgmr.msra.gmra.mrb[10].mxu0 %vm189_vm2, %v885_v41 }
 0x9cf   :  { %3033 = vmatpush3.bf16.msra.mxu0 %v3378_v6  ;;  %2820 = vmatprep.mubr.msk.f32.mxu0 %vm3277_vm0, %v3278_v2 }
 0x9d0   :  { %3034 = vmatprep.subr.bf16.mxu0 %v3276_v1 }
 0x9d3   :  { %3036 = vmatpush3.bf16.msra.mxu0 %v3398_v12 }
 0x9d4   :  { %3043 = vmatprep.subr.bf16.mxu0 %v3276_v1 }
 0x9d6   :  { %2821 = vmatmul.mubr.msk.f32.vlgmr.msra.gmra.mrb[12].mxu0 %vm189_vm2, %v885_v41 }
 0x9d7   :  { %3045 = vmatpush3.bf16.msra.mxu0 %v3435_v35  ;;  %2842 = vmatprep.mubr.msk.f32.mxu0 %vm3277_vm0, %v3278_v2 }
 0x9d8   :  { %3046 = vmatprep.subr.bf16.mxu0 %v3276_v1 }
 0x9db   :  { %3048 = vmatpush3.bf16.msra.mxu0 %v3458_v43 }
 0x9dc   :  { %3055 = vmatprep.subr.bf16.mxu0 %v3276_v1 }
 0xa3e   :  { %v1029_v42 = vpop.f32.mrb[8].mxu1 }
 0xa3f   :  { %v1040_v20 = vadd.f32 %v1029_v42, %v3496_v55  ;;  %v2811_v44 = vpop.f32.mrb[9].mxu1 }
 0xa41   :  { %1042 = vrot.lane.b32.xlu0 %v1040_v20, %s3279_s16 }
 0xaa1   :  { %v954_v46 = vpop.f32.mrb[10].mxu0 }
 0xaa2   :  { %v955_v47 = vadd.f32 %v3517_v58, %v954_v46  ;;  %v2800_v48 = vpop.f32.mrb[11].mxu0 }
 0xaa4   :  { %v1033_v49 = vadd.f32 %v1029_v42, %v955_v47 }
 0xaa6   :  { %v2552_v50 = vmul.f32 -1.442695, %v1033_v49 }
 0xaa8   :  { %3159 = vpow2.f32 %v2552_v50 }
 0xaa9   :  { %v1129_v53 = vpop.f32.mrb[12].mxu0 }
 0xaaa   :  { %v1143_v54 = vadd.f32 %v1129_v53, %v3410_v15  ;;  %v2822_v56 = vpop.f32.mrb[13].mxu0  ;;  %v1134_v0 = vrot.slane %v1129_v53, 4 }
 0xaac   :  { %v1145_v57 = vrot.slane %v1143_v54, 4  ;;  %v1136_v3 = vadd.f32 %v1134_v0, %v3568_v8 }
 0xaae   :  { %1146 = vrot.lane.b32.xlu1 %v1145_v57, %s3279_s16  ;;  %v2554_v4 = vmul.f32 -1.442695, %v1136_v3 }
 0xab2   :  { %v3160_v59 = vpop.eup %3159 }
 0xab3   :  { %v1037_v60 = vadd.f32 1.0, %v3160_v59  ;;  %v1043_v62 = vpop.permute.xlu0 %1042  ;;  %v3660_v59 = vadd.f32 %v3417_v19, %v3494_v52 }
 0xab5   :  { %3161 = vrcp.f32 %v1037_v60 }
 0xab6   :  { %3163 = vpow2.f32 %v2554_v4 }
 0xabf   :  { %v3162_v61 = vpop.eup %3161 }
 0xac0   :  { %v1045_v63 = vmul.f32 %v3162_v61, %v1043_v62  ;;  %v3164_v5 = vpop.eup %3163 }
 0xac1   :  { %v1140_v7 = vadd.f32 1.0, %v3164_v5 }
 0xac2   :  { %1047 = vrot.lane.b32.xlu0 %v1045_v63, %s3279_s16 }
 0xac3   :  { %3165 = vrcp.f32 %v1140_v7 }
 0xacd   :  { %v3166_v9 = vpop.eup %3165 }
 0xb20   :  { %v1147_v10 = vpop.permute.xlu1 %1146 }
 0xb21   :  { %v1149_v11 = vmul.f32 %v3166_v9, %v1147_v10 }
 0xb23   :  { %1151 = vrot.lane.b32.xlu1 %v1149_v11, %s3279_s16 }
 0xb34   :  { %v1048_v14 = vpop.permute.xlu0 %1047 }
 0xb35   :  { %v1050_v16 = vadd.f32 %v1048_v14, %v955_v47 }
 0xb37   :  { %3167 = vtanh.f32 %v1050_v16 }
 0xb41   :  { %v3168_v17 = vpop.eup %3167 }
 0xb42   :  { %v1052_v18 = vsub.f32 %v3579_v36, %v3168_v17 }
 0xb44   :  { %1054 = vrot.lane.b32.xlu0 %v1052_v18, %s3280_s3 }
 0xb95   :  { %v1152_v21 = vpop.permute.xlu1 %1151 }
 0xb96   :  { %v1154_v22 = vadd.f32 %v1152_v21, %v3568_v8 }
 0xb98   :  { %3169 = vtanh.f32 %v1154_v22 }
 0xba2   :  { %v3170_v23 = vpop.eup %3169 }
 0xba3   :  { %v1157_v24 = vrot.slane %v3170_v23, 4 }
 0xba5   :  { %v1159_v13 = vsub.f32 %v3583_v38, %v1157_v24 }
 0xba7   :  { %v1161_v25 = vrot.slane %v1159_v13, 4 }
 0xba9   :  { %1162 = vrot.lane.b32.xlu1 %v1161_v25, %s3280_s3 }
 0xbb6   :  { %v1055_v26 = vpop.permute.xlu0 %1054 }
 0xbb7   :  { %v1057_v27 = vmul.f32 %v3162_v61, %v1055_v26 }
 0xbb9   :  { %1059 = vrot.lane.b32.xlu0 %v1057_v27, %s3281_s0 }
 0xc1b   :  { %v1163_v28 = vpop.permute.xlu1 %1162 }
 0xc1c   :  { %v1165_v29 = vmul.f32 %v3166_v9, %v1163_v28 }
 0xc1e   :  { %1167 = vrot.lane.b32.xlu1 %v1165_v29, %s3281_s0 }
 0xc2b   :  { %v1060_v30 = vpop.permute.xlu0 %1059 }
 0xc2c   :  { %v3623_v31 = vadd.f32 %v3168_v17, %v1060_v30 }
 0xc2e   :  { %1248 = vrot.lane.b32.xlu0 %v3623_v31, %s3279_s16 }
 0xc90   :  { %v1168_v8 = vpop.permute.xlu1 %1167 }
 0xc91   :  { %v3627_v32 = vadd.f32 %v3170_v23, %v1168_v8 }
 0xc93   :  { %v1172_v33 = vrot.slane %v3627_v32, 4 }
 0xc95   :  { %1173 = vrot.lane.b32.xlu1 %v1172_v33, %s3279_s16 }
 0xca0   :  { %v1249_v34 = vpop.permute.xlu0 %1248 }
 0xca1   :  { %2843 = vmatmul.mubr.msk.f32.vlgmr.msra.gmra.mrb[14].mxu0 %vm189_vm2, %v1249_v34 }
 0xca2   :  { %3057 = vmatpush3.bf16.msra.mxu0 %v3446_v39  ;;  %2864 = vmatprep.mubr.msk.f32.mxu0 %vm3277_vm0, %v3278_v2 }
 0xca3   :  { %3058 = vmatprep.subr.bf16.mxu0 %v3276_v1 }
 0xca6   :  { %3060 = vmatpush3.bf16.msra.mxu0 %v3466_v45 }
 0xca7   :  { %3067 = vmatprep.subr.bf16.mxu0 %v3276_v1 }
 0xd07   :  { %v1174_v36 = vpop.permute.xlu1 %1173 }
 0xd08   :  { %2832 = vmatmul.mubr.msk.f32.vlgmr.msra.gmra.mrb[10].mxu1 %vm189_vm2, %v1174_v36 }
 0xd09   :  { %3051 = vmatpush3.bf16.msra.mxu1 %v3378_v6  ;;  %2853 = vmatprep.mubr.msk.f32.mxu1 %vm3277_vm0, %v3278_v2 }
 0xd0a   :  { %3052 = vmatprep.subr.bf16.mxu1 %v3276_v1 }
 0xd0d   :  { %3054 = vmatpush3.bf16.msra.mxu1 %v3398_v12 }
 0xd0e   :  { %3061 = vmatprep.subr.bf16.mxu1 %v3276_v1 }
 0xd10   :  { %2854 = vmatmul.mubr.msk.f32.vlgmr.msra.gmra.mrb[12].mxu1 %vm189_vm2, %v1174_v36 }
 0xd11   :  { %3063 = vmatpush3.bf16.msra.mxu1 %v3435_v35  ;;  %2875 = vmatprep.mubr.msk.f32.mxu1 %vm3277_vm0, %v3278_v2 }
 0xd12   :  { %3064 = vmatprep.subr.bf16.mxu1 %v3276_v1 }
 0xd15   :  { %3066 = vmatpush3.bf16.msra.mxu1 %v3458_v43 }
 0xd16   :  { %3073 = vmatprep.subr.bf16.mxu1 %v3276_v1 }
 0xd74   :  { %v1318_v37 = vpop.f32.mrb[14].mxu0 }
 0xd75   :  { %v1329_v38 = vadd.f32 %v1318_v37, %v3496_v55  ;;  %v2844_v40 = vpop.f32.mrb[15].mxu0 }
 0xd77   :  { %1331 = vrot.lane.b32.xlu0 %v1329_v38, %s3279_s16 }
 0xddb   :  { %v1243_v41 = vpop.f32.mrb[10].mxu1 }
 0xddc   :  { %v1244_v42 = vadd.f32 %v3517_v58, %v1243_v41  ;;  %v2833_v20 = vpop.f32.mrb[11].mxu1 }
 0xdde   :  { %v1322_v44 = vadd.f32 %v1318_v37, %v1244_v42 }
 0xde0   :  { %v2557_v46 = vmul.f32 -1.442695, %v1322_v44 }
 0xde2   :  { %3171 = vpow2.f32 %v2557_v46 }
 0xde3   :  { %v1418_v47 = vpop.f32.mrb[12].mxu1 }
 0xde4   :  { %v1429_v48 = vadd.f32 %v1418_v47, %v3410_v15  ;;  %v2855_v49 = vpop.f32.mrb[13].mxu1  ;;  %v1422_v60 = vadd.f32 %v1418_v47, %v3660_v59 }
 0xde6   :  { %1431 = vrot.lane.b32.xlu1 %v1429_v48, %s3279_s16  ;;  %v2559_v61 = vmul.f32 -1.442695, %v1422_v60 }
 0xde9   :  { %v1332_v56 = vpop.permute.xlu0 %1331 }
 0xdec   :  { %v3172_v50 = vpop.eup %3171 }
 0xded   :  { %v1326_v53 = vadd.f32 1.0, %v3172_v50 }
 0xdef   :  { %3173 = vrcp.f32 %v1326_v53 }
 0xdf0   :  { %3175 = vpow2.f32 %v2559_v61 }
 0xdf9   :  { %v3174_v54 = vpop.eup %3173 }
 0xdfa   :  { %v1334_v57 = vmul.f32 %v3174_v54, %v1332_v56  ;;  %v3176_v62 = vpop.eup %3175 }
 0xdfb   :  { %v1426_v63 = vadd.f32 1.0, %v3176_v62 }
 0xdfc   :  { %1336 = vrot.lane.b32.xlu0 %v1334_v57, %s3279_s16 }
 0xdfd   :  { %3177 = vrcp.f32 %v1426_v63 }
 0xe07   :  { %v3178_v0 = vpop.eup %3177 }
 0xe58   :  { %v1432_v3 = vpop.permute.xlu1 %1431 }
 0xe59   :  { %v1434_v4 = vmul.f32 %v3178_v0, %v1432_v3 }
 0xe5b   :  { %1436 = vrot.lane.b32.xlu1 %v1434_v4, %s3279_s16 }
 0xe6e   :  { %v1337_v5 = vpop.permute.xlu0 %1336 }
 0xe6f   :  { %v1339_v7 = vadd.f32 %v1337_v5, %v1244_v42 }
 0xe71   :  { %3179 = vtanh.f32 %v1339_v7 }
 0xe7b   :  { %v3180_v9 = vpop.eup %3179 }
 0xe7c   :  { %v1341_v10 = vsub.f32 %v3623_v31, %v3180_v9 }
 0xe7e   :  { %1343 = vrot.lane.b32.xlu0 %v1341_v10, %s3280_s3 }
 0xecd   :  { %v1437_v52 = vpop.permute.xlu1 %1436 }
 0xece   :  { %v1439_v11 = vadd.f32 %v1437_v52, %v3660_v59 }
 0xed0   :  { %3181 = vtanh.f32 %v1439_v11 }
 0xeda   :  { %v3182_v14 = vpop.eup %3181 }
 0xedb   :  { %v1442_v16 = vrot.slane %v3182_v14, 4 }
 0xedd   :  { %v1444_v17 = vsub.f32 %v3627_v32, %v1442_v16 }
 0xedf   :  { %v1446_v18 = vrot.slane %v1444_v17, 4 }
 0xee1   :  { %1447 = vrot.lane.b32.xlu1 %v1446_v18, %s3280_s3 }
 0xef0   :  { %v1344_v21 = vpop.permute.xlu0 %1343 }
 0xef1   :  { %v1346_v22 = vmul.f32 %v3174_v54, %v1344_v21 }
 0xef3   :  { %1348 = vrot.lane.b32.xlu0 %v1346_v22, %s3281_s0 }
 0xf53   :  { %v1448_v23 = vpop.permute.xlu1 %1447 }
 0xf54   :  { %v1450_v24 = vmul.f32 %v3178_v0, %v1448_v23 }
 0xf56   :  { %1452 = vrot.lane.b32.xlu1 %v1450_v24, %s3281_s0 }
 0xf65   :  { %v1349_v13 = vpop.permute.xlu0 %1348 }
 0xf66   :  { %v3671_v25 = vadd.f32 %v3180_v9, %v1349_v13 }
 0xf68   :  { %1532 = vrot.lane.b32.xlu0 %v3671_v25, %s3279_s16 }
 0xfc8   :  { %v1453_v26 = vpop.permute.xlu1 %1452 }
 0xfc9   :  { %v3675_v27 = vadd.f32 %v3182_v14, %v1453_v26 }
 0xfcb   :  { %1457 = vrot.lane.b32.xlu1 %v3675_v27, %s3279_s16 }
 0xfda   :  { %v1533_v28 = vpop.permute.xlu0 %1532 }
 0xfdb   :  { %2876 = vmatmul.mubr.msk.f32.vlgmr.msra.gmra.mrb[14].mxu1 %vm189_vm2, %v1533_v28 }
 0xfdc   :  { %3075 = vmatpush3.bf16.msra.mxu1 %v3446_v39  ;;  %2897 = vmatprep.mubr.msk.f32.mxu1 %vm3277_vm0, %v3278_v2 }
 0xfdd   :  { %3076 = vmatprep.subr.bf16.mxu1 %v3276_v1 }
 0xfe0   :  { %3078 = vmatpush3.bf16.msra.mxu1 %v3466_v45 }
 0xfe1   :  { %3085 = vmatprep.subr.bf16.mxu1 %v3276_v1 }
0x103d   :  { %v1458_v29 = vpop.permute.xlu1 %1457 }
0x103e   :  { %2865 = vmatmul.mubr.msk.f32.vlgmr.msra.gmra.mrb[16].mxu0 %vm189_vm2, %v1458_v29 }
0x103f   :  { %3069 = vmatpush3.bf16.msra.mxu0 %v3378_v6  ;;  %2886 = vmatprep.mubr.msk.f32.mxu0 %vm3277_vm0, %v3278_v2 }
0x1040   :  { %3070 = vmatprep.subr.bf16.mxu0 %v3276_v1 }
0x1043   :  { %3072 = vmatpush3.bf16.msra.mxu0 %v3398_v12 }
0x1044   :  { %3079 = vmatprep.subr.bf16.mxu0 %v3276_v1 }
0x1046   :  { %2887 = vmatmul.mubr.msk.f32.vlgmr.msra.gmra.mrb[18].mxu0 %vm189_vm2, %v1458_v29 }
0x1047   :  { %3081 = vmatpush3.bf16.msra.mxu0 %v3435_v35  ;;  %2908 = vmatprep.mubr.msk.f32.mxu0 %vm3277_vm0, %v3278_v2 }
0x1048   :  { %3082 = vmatprep.subr.bf16.mxu0 %v3276_v1 }
0x104b   :  { %3084 = vmatpush3.bf16.msra.mxu0 %v3458_v43 }
0x104c   :  { %3091 = vmatprep.subr.bf16.mxu0 %v3276_v1 }
0x10ae   :  { %v1602_v30 = vpop.f32.mrb[14].mxu1 }
0x10af   :  { %v1613_v31 = vadd.f32 %v1602_v30, %v3496_v55  ;;  %v2877_v8 = vpop.f32.mrb[15].mxu1 }
0x10b1   :  { %1615 = vrot.lane.b32.xlu0 %v1613_v31, %s3279_s16 }
0x1111   :  { %v1527_v32 = vpop.f32.mrb[16].mxu0 }
0x1112   :  { %v1528_v33 = vadd.f32 %v3517_v58, %v1527_v32  ;;  %v2866_v34 = vpop.f32.mrb[17].mxu0 }
0x1114   :  { %v1606_v36 = vadd.f32 %v1602_v30, %v1528_v33 }
0x1116   :  { %v2562_v37 = vmul.f32 -1.442695, %v1606_v36 }
0x1118   :  { %3183 = vpow2.f32 %v2562_v37 }
0x1119   :  { %v1702_v38 = vpop.f32.mrb[18].mxu0 }
0x111a   :  { %v1716_v40 = vadd.f32 %v1702_v38, %v3410_v15  ;;  %v2888_v41 = vpop.f32.mrb[19].mxu0  ;;  %v1707_v49 = vrot.slane %v1702_v38, 4 }
0x111c   :  { %v1718_v42 = vrot.slane %v1716_v40, 4  ;;  %v1709_v50 = vadd.f32 %v1707_v49, %v3660_v59 }
0x111e   :  { %1719 = vrot.lane.b32.xlu1 %v1718_v42, %s3279_s16  ;;  %v2564_v53 = vmul.f32 -1.442695, %v1709_v50  ;;  %v3752_v42 = vadd.f32 %v3492_v51, %v3417_v19 }
0x1122   :  { %v3184_v20 = vpop.eup %3183 }
0x1123   :  { %v1610_v44 = vadd.f32 1.0, %v3184_v20  ;;  %v1616_v47 = vpop.permute.xlu0 %1615 }
0x1125   :  { %3185 = vrcp.f32 %v1610_v44 }
0x1126   :  { %3187 = vpow2.f32 %v2564_v53 }
0x112f   :  { %v3186_v46 = vpop.eup %3185 }
0x1130   :  { %v1618_v48 = vmul.f32 %v3186_v46, %v1616_v47  ;;  %v3188_v54 = vpop.eup %3187 }
0x1131   :  { %v1713_v56 = vadd.f32 1.0, %v3188_v54 }
0x1132   :  { %1620 = vrot.lane.b32.xlu0 %v1618_v48, %s3279_s16 }
0x1133   :  { %3189 = vrcp.f32 %v1713_v56 }
0x113d   :  { %v3190_v57 = vpop.eup %3189 }
0x1190   :  { %v1720_v60 = vpop.permute.xlu1 %1719 }
0x1191   :  { %v1722_v61 = vmul.f32 %v3190_v57, %v1720_v60 }
0x1193   :  { %1724 = vrot.lane.b32.xlu1 %v1722_v61, %s3279_s16 }
0x11a4   :  { %v1621_v62 = vpop.permute.xlu0 %1620 }
0x11a5   :  { %v1623_v63 = vadd.f32 %v1621_v62, %v1528_v33 }
0x11a7   :  { %3191 = vtanh.f32 %v1623_v63 }
0x11b1   :  { %v3192_v0 = vpop.eup %3191 }
0x11b2   :  { %v1625_v3 = vsub.f32 %v3671_v25, %v3192_v0 }
0x11b4   :  { %1627 = vrot.lane.b32.xlu1 %v1625_v3, %s3280_s3 }
0x1205   :  { %v1725_v4 = vpop.permute.xlu1 %1724 }
0x1206   :  { %v1727_v5 = vadd.f32 %v1725_v4, %v3660_v59 }
0x1208   :  { %3193 = vtanh.f32 %v1727_v5 }
0x1212   :  { %v3194_v7 = vpop.eup %3193 }
0x1213   :  { %v1730_v9 = vrot.slane %v3194_v7, 4 }
0x1215   :  { %v1732_v10 = vsub.f32 %v3675_v27, %v1730_v9 }
0x1217   :  { %v1734_v52 = vrot.slane %v1732_v10, 4 }
0x1219   :  { %1735 = vrot.lane.b32.xlu0 %v1734_v52, %s3280_s3 }
0x1226   :  { %v1628_v11 = vpop.permute.xlu1 %1627 }
0x1227   :  { %v1630_v14 = vmul.f32 %v3186_v46, %v1628_v11 }
0x1229   :  { %1632 = vrot.lane.b32.xlu1 %v1630_v14, %s3281_s0 }
0x128b   :  { %v1736_v16 = vpop.permute.xlu0 %1735 }
0x128c   :  { %v1738_v17 = vmul.f32 %v3190_v57, %v1736_v16 }
0x128e   :  { %1740 = vrot.lane.b32.xlu0 %v1738_v17, %s3281_s0 }
0x129b   :  { %v1633_v18 = vpop.permute.xlu1 %1632 }
0x129c   :  { %v3715_v21 = vadd.f32 %v3192_v0, %v1633_v18 }
0x129e   :  { %1821 = vrot.lane.b32.xlu1 %v3715_v21, %s3279_s16 }
0x1300   :  { %v1741_v59 = vpop.permute.xlu0 %1740 }
0x1301   :  { %v3719_v22 = vadd.f32 %v3194_v7, %v1741_v59 }
0x1303   :  { %v1745_v23 = vrot.slane %v3719_v22, 4 }
0x1305   :  { %1746 = vrot.lane.b32.xlu0 %v1745_v23, %s3279_s16 }
0x1310   :  { %v1822_v24 = vpop.permute.xlu1 %1821 }
0x1311   :  { %2909 = vmatmul.mubr.msk.f32.vlgmr.msra.gmra.mrb[20].mxu0 %vm189_vm2, %v1822_v24 }
0x1312   :  { %3093 = vmatpush3.bf16.msra.mxu0 %v3446_v39  ;;  %2930 = vmatprep.mubr.msk.f32.mxu0 %vm3277_vm0, %v3278_v2 }
0x1313   :  { %3094 = vmatprep.subr.bf16.mxu0 %v3276_v1 }
0x1316   :  { %3096 = vmatpush3.bf16.msra.mxu0 %v3466_v45 }
0x1317   :  { %3103 = vmatprep.subr.bf16.mxu0 %v3276_v1 }
0x1377   :  { %v1747_v13 = vpop.permute.xlu0 %1746 }
0x1378   :  { %2898 = vmatmul.mubr.msk.f32.vlgmr.msra.gmra.mrb[16].mxu1 %vm189_vm2, %v1747_v13 }
0x1379   :  { %3087 = vmatpush3.bf16.msra.mxu1 %v3378_v6  ;;  %2919 = vmatprep.mubr.msk.f32.mxu1 %vm3277_vm0, %v3278_v2 }
0x137a   :  { %3088 = vmatprep.subr.bf16.mxu1 %v3276_v1 }
0x137d   :  { %3090 = vmatpush3.bf16.msra.mxu1 %v3398_v12 }
0x137e   :  { %3097 = vmatprep.subr.bf16.mxu1 %v3276_v1 }
0x1380   :  { %2920 = vmatmul.mubr.msk.f32.vlgmr.msra.gmra.mrb[18].mxu1 %vm189_vm2, %v1747_v13 }
0x1381   :  { %3099 = vmatpush3.bf16.msra.mxu1 %v3435_v35  ;;  %2941 = vmatprep.mubr.msk.f32.mxu1 %vm3277_vm0, %v3278_v2 }
0x1382   :  { %3100 = vmatprep.subr.bf16.mxu1 %v3276_v1 }
0x1385   :  { %3102 = vmatpush3.bf16.msra.mxu1 %v3458_v43 }
0x1386   :  { %3109 = vmatprep.subr.bf16.mxu1 %v3276_v1 }
0x13e4   :  { %v1891_v25 = vpop.f32.mrb[20].mxu0 }
0x13e5   :  { %v1902_v26 = vadd.f32 %v1891_v25, %v3496_v55  ;;  %v2910_v27 = vpop.f32.mrb[21].mxu0 }
0x13e7   :  { %1904 = vrot.lane.b32.xlu1 %v1902_v26, %s3279_s16 }
0x144b   :  { %v1816_v28 = vpop.f32.mrb[16].mxu1 }
0x144c   :  { %v1817_v29 = vadd.f32 %v3517_v58, %v1816_v28  ;;  %v2899_v30 = vpop.f32.mrb[17].mxu1 }
0x144e   :  { %v1895_v31 = vadd.f32 %v1891_v25, %v1817_v29 }
0x1450   :  { %v2567_v8 = vmul.f32 -1.442695, %v1895_v31 }
0x1452   :  { %3195 = vpow2.f32 %v2567_v8 }
0x1453   :  { %v1991_v32 = vpop.f32.mrb[18].mxu1 }
0x1454   :  { %v2002_v33 = vadd.f32 %v1991_v32, %v3410_v15  ;;  %v2921_v34 = vpop.f32.mrb[19].mxu1  ;;  %v1995_v20 = vadd.f32 %v1991_v32, %v3752_v42 }
0x1456   :  { %2004 = vrot.lane.b32.xlu0 %v2002_v33, %s3279_s16  ;;  %v2569_v44 = vmul.f32 -1.442695, %v1995_v20 }
0x1459   :  { %v1905_v40 = vpop.permute.xlu1 %1904 }
0x145c   :  { %v3196_v36 = vpop.eup %3195 }
0x145d   :  { %v1899_v37 = vadd.f32 1.0, %v3196_v36 }
0x145f   :  { %3197 = vrcp.f32 %v1899_v37 }
0x1460   :  { %3199 = vpow2.f32 %v2569_v44 }
0x1469   :  { %v3198_v38 = vpop.eup %3197 }
0x146a   :  { %v1907_v41 = vmul.f32 %v3198_v38, %v1905_v40  ;;  %v3200_v46 = vpop.eup %3199 }
0x146b   :  { %v1999_v47 = vadd.f32 1.0, %v3200_v46 }
0x146c   :  { %1909 = vrot.lane.b32.xlu1 %v1907_v41, %s3279_s16 }
0x146d   :  { %3201 = vrcp.f32 %v1999_v47 }
0x1477   :  { %v3202_v48 = vpop.eup %3201 }
0x14c8   :  { %v2005_v49 = vpop.permute.xlu0 %2004 }
0x14c9   :  { %v2007_v50 = vmul.f32 %v3202_v48, %v2005_v49 }
0x14cb   :  { %2009 = vrot.lane.b32.xlu0 %v2007_v50, %s3279_s16 }
0x14de   :  { %v1910_v53 = vpop.permute.xlu1 %1909 }
0x14df   :  { %v1912_v54 = vadd.f32 %v1910_v53, %v1817_v29 }
0x14e1   :  { %3203 = vtanh.f32 %v1912_v54 }
0x14eb   :  { %v3204_v56 = vpop.eup %3203 }
0x14ec   :  { %v1914_v57 = vsub.f32 %v3715_v21, %v3204_v56 }
0x14ee   :  { %1916 = vrot.lane.b32.xlu1 %v1914_v57, %s3280_s3 }
0x153d   :  { %v2010_v19 = vpop.permute.xlu0 %2009 }
0x153e   :  { %v2012_v51 = vadd.f32 %v2010_v19, %v3752_v42 }
0x1540   :  { %3205 = vtanh.f32 %v2012_v51 }
0x154a   :  { %v3206_v60 = vpop.eup %3205 }
0x154b   :  { %v2015_v61 = vrot.slane %v3206_v60, 4 }
0x154d   :  { %v2017_v62 = vsub.f32 %v3719_v22, %v2015_v61  ;;  %v3225_v61 = vld [vmem:[%s3825_s7] ss:$0 sm:$0xff] }
0x154f   :  { %v2019_v63 = vrot.slane %v2017_v62, 4 }
0x1551   :  { %2020 = vrot.lane.b32.xlu0 %v2019_v63, %s3280_s3 }
0x1560   :  { %v1917_v0 = vpop.permute.xlu1 %1916 }
0x1561   :  { %v1919_v3 = vmul.f32 %v3198_v38, %v1917_v0 }
0x1563   :  { %1921 = vrot.lane.b32.xlu1 %v1919_v3, %s3281_s0 }
0x15c3   :  { %v2021_v4 = vpop.permute.xlu0 %2020 }
0x15c4   :  { %v2023_v5 = vmul.f32 %v3202_v48, %v2021_v4 }
0x15c6   :  { %2025 = vrot.lane.b32.xlu0 %v2023_v5, %s3281_s0 }
0x15d5   :  { %v1922_v7 = vpop.permute.xlu1 %1921 }
0x15d6   :  { %v1924_v9 = vadd.f32 %v3204_v56, %v1922_v7 }
0x15d8   :  { %2105 = vrot.lane.b32.xlu1 %v1924_v9, %s3279_s16 }
0x1638   :  { %v2026_v10 = vpop.permute.xlu0 %2025 }
0x1639   :  { %v3764_v52 = vadd.f32 %v3206_v60, %v2026_v10 }
0x163b   :  { %2030 = vrot.lane.b32.xlu0 %v3764_v52, %s3279_s16 }
0x164a   :  { %v2106_v11 = vpop.permute.xlu1 %2105 }
0x164b   :  { %2942 = vmatmul.mubr.msk.f32.vlgmr.msra.gmra.mrb[20].mxu1 %vm189_vm2, %v2106_v11 }
0x164c   :  { %3111 = vmatpush3.bf16.msra.mxu1 %v3446_v39  ;;  %2963 = vmatprep.mubr.msk.f32.mxu1 %vm3277_vm0, %v3278_v2 }
0x164d   :  { %3112 = vmatprep.subr.bf16.mxu1 %v3276_v1 }
0x1650   :  { %3114 = vmatpush3.bf16.msra.mxu1 %v3466_v45 }
0x16ad   :  { %v2031_v14 = vpop.permute.xlu0 %2030 }
0x16ae   :  { %2931 = vmatmul.mubr.msk.f32.vlgmr.msra.gmra.mrb[22].mxu0 %vm189_vm2, %v2031_v14 }
0x16af   :  { %3105 = vmatpush3.bf16.msra.mxu0 %v3378_v6  ;;  %2952 = vmatprep.mubr.msk.f32.mxu0 %vm3277_vm0, %v3278_v2 }
0x16b0   :  { %3106 = vmatprep.subr.bf16.mxu0 %v3276_v1 }
0x16b3   :  { %3108 = vmatpush3.bf16.msra.mxu0 %v3398_v12 }
0x16b4   :  { %3115 = vmatprep.subr.bf16.mxu0 %v3276_v1 }
0x16b6   :  { %2953 = vmatmul.mubr.msk.f32.vlgmr.msra.gmra.mrb[24].mxu0 %vm189_vm2, %v2031_v14 }
0x16b7   :  { %3117 = vmatpush3.bf16.msra.mxu0 %v3435_v35  ;;  %2974 = vmatprep.mubr.msk.f32.mxu0 %vm3277_vm0, %v3278_v2 }
0x16b8   :  { %3118 = vmatprep.subr.bf16.mxu0 %v3276_v1 }
0x16bb   :  { %3120 = vmatpush3.bf16.msra.mxu0 %v3458_v43 }
0x171e   :  { %v2175_v6 = vpop.f32.mrb[20].mxu1 }
0x171f   :  { %v2186_v39 = vadd.f32 %v2175_v6, %v3496_v55  ;;  %v2943_v45 = vpop.f32.mrb[21].mxu1 }
0x1721   :  { %2188 = vrot.lane.b32.xlu1 %v2186_v39, %s3279_s16 }
0x1781   :  { %v2100_v12 = vpop.f32.mrb[22].mxu0 }
0x1782   :  { %v2101_v16 = vadd.f32 %v3517_v58, %v2100_v12  ;;  %v2932_v17 = vpop.f32.mrb[23].mxu0 }
0x1784   :  { %v2179_v18 = vadd.f32 %v2175_v6, %v2101_v16  ;;  %v2578_v6 = vld [vmem:[#allocation5] ss:$0 sm:$0xff] }
0x1786   :  { %v2572_v21 = vmul.f32 -1.442695, %v2179_v18 }
0x1788   :  { %3207 = vpow2.f32 %v2572_v21 }
0x1789   :  { %v2275_v35 = vpop.f32.mrb[24].mxu0 }
0x178a   :  { %v2289_v2 = vadd.f32 %v2275_v35, %v3410_v15  ;;  %v2954_v59 = vpop.f32.mrb[25].mxu0  ;;  %v2280_v58 = vrot.slane %v2275_v35, 4 }
0x178c   :  { %v2291_v1 = vrot.slane %v2289_v2, 4  ;;  %v2282_v25 = vadd.f32 %v2280_v58, %v3752_v42  ;;  %v2579_v2 = vld [vmem:[#allocation2] ss:$0 sm:$0xff] }
0x178e   :  { %2292 = vrot.lane.b32.xlu0 %v2291_v1, %s3279_s16  ;;  %v2574_v26 = vmul.f32 -1.442695, %v2282_v25 }
0x1792   :  { %v3208_v43 = vpop.eup %3207 }
0x1793   :  { %v2183_v22 = vadd.f32 1.0, %v3208_v43  ;;  %v2189_v24 = vpop.permute.xlu1 %2188 }
0x1795   :  { %3209 = vrcp.f32 %v2183_v22 }
0x1796   :  { %3211 = vpow2.f32 %v2574_v26 }
0x179f   :  { %v3210_v23 = vpop.eup %3209 }
0x17a0   :  { %v2191_v13 = vmul.f32 %v3210_v23, %v2189_v24  ;;  %v3212_v27 = vpop.eup %3211 }
0x17a1   :  { %v2286_v28 = vadd.f32 1.0, %v3212_v27 }
0x17a2   :  { %2193 = vrot.lane.b32.xlu1 %v2191_v13, %s3279_s16 }
0x17a3   :  { %3213 = vrcp.f32 %v2286_v28 }
0x17ad   :  { %v3214_v15 = vpop.eup %3213 }
0x1800   :  { %v2293_v29 = vpop.permute.xlu0 %2292 }
0x1801   :  { %v2295_v30 = vmul.f32 %v3214_v15, %v2293_v29 }
0x1803   :  { %2297 = vrot.lane.b32.xlu0 %v2295_v30, %s3279_s16 }
0x1814   :  { %v2194_v31 = vpop.permute.xlu1 %2193 }
0x1815   :  { %v2196_v8 = vadd.f32 %v2194_v31, %v2101_v16 }
0x1817   :  { %3215 = vtanh.f32 %v2196_v8 }
0x1821   :  { %v3216_v32 = vpop.eup %3215 }
0x1822   :  { %v2198_v33 = vsub.f32 %v1924_v9, %v3216_v32 }
0x1824   :  { %2200 = vrot.lane.b32.xlu1 %v2198_v33, %s3280_s3 }
0x1875   :  { %v2298_v34 = vpop.permute.xlu0 %2297 }
0x1876   :  { %v2300_v36 = vadd.f32 %v2298_v34, %v3752_v42 }
0x1878   :  { %3217 = vtanh.f32 %v2300_v36 }
0x1882   :  { %v3218_v37 = vpop.eup %3217 }
0x1883   :  { %v2303_v38 = vrot.slane %v3218_v37, 4 }
0x1885   :  { %v2305_v40 = vsub.f32 %v3764_v52, %v2303_v38 }
0x1887   :  { %v2307_v41 = vrot.slane %v2305_v40, 4 }
0x1889   :  { %2308 = vrot.lane.b32.xlu0 %v2307_v41, %s3280_s3 }
0x1896   :  { %v2201_v20 = vpop.permute.xlu1 %2200 }
0x1897   :  { %v2203_v44 = vmul.f32 %v3210_v23, %v2201_v20 }
0x1899   :  { %2205 = vrot.lane.b32.xlu1 %v2203_v44, %s3281_s0 }
0x18fb   :  { %v2309_v46 = vpop.permute.xlu0 %2308 }
0x18fc   :  { %v2311_v47 = vmul.f32 %v3214_v15, %v2309_v46 }
0x18fe   :  { %2313 = vrot.lane.b32.xlu0 %v2311_v47, %s3281_s0 }
0x190b   :  { %v2206_v48 = vpop.permute.xlu1 %2205 }
0x190c   :  { %v2208_v49 = vadd.f32 %v3216_v32, %v2206_v48 }
0x190e   :  { %2394 = vrot.lane.b32.xlu1 %v2208_v49, %s3279_s16 }
0x1970   :  { %v2314_v42 = vpop.permute.xlu0 %2313 }
0x1971   :  { %v2316_v50 = vadd.f32 %v3218_v37, %v2314_v42 }
0x1973   :  { %v2318_v53 = vrot.slane %v2316_v50, 4 }
0x1975   :  { %2319 = vrot.lane.b32.xlu0 %v2318_v53, %s3279_s16 }
0x1980   :  { %v2395_v54 = vpop.permute.xlu1 %2394 }
0x1981   :  { %2975 = vmatmul.mubr.msk.f32.vlgmr.msra.gmra.mrb[26].mxu0 %vm189_vm2, %v2395_v54 }
0x19e7   :  { %v2320_v56 = vpop.permute.xlu0 %2319 }
0x19e8   :  { %2964 = vmatmul.mubr.msk.f32.vlgmr.msra.gmra.mrb[22].mxu1 %vm189_vm2, %v2320_v56 }
0x1a54   :  { %v2464_v57 = vpop.f32.mrb[26].mxu0 }
0x1a55   :  { %v2475_v19 = vadd.f32 %v2464_v57, %v3496_v55  ;;  %v2976_v51 = vpop.f32.mrb[27].mxu0 }
0x1a57   :  { %2477 = vrot.lane.b32.xlu1 %v2475_v19, %s3279_s16 }
0x1abb   :  { %v2389_v60 = vpop.f32.mrb[22].mxu1 }
0x1abc   :  { %v2390_v62 = vadd.f32 %v3225_v61, %v2389_v60  ;;  %v2965_v63 = vpop.f32.mrb[23].mxu1 }
0x1abe   :  { %v2468_v0 = vadd.f32 %v2464_v57, %v2390_v62 }
0x1ac0   :  { %v2577_v3 = vmul.f32 -1.442695, %v2468_v0 }
0x1ac2   :  { %3219 = vpow2.f32 %v2577_v3 }
0x1ac9   :  { %v2478_v9 = vpop.permute.xlu1 %2477 }
0x1acc   :  { %v3220_v4 = vpop.eup %3219 }
0x1acd   :  { %v2472_v5 = vadd.f32 1.0, %v3220_v4 }
0x1acf   :  { %3221 = vrcp.f32 %v2472_v5 }
0x1ad9   :  { %v3222_v7 = vpop.eup %3221 }
0x1ada   :  { %v2480_v10 = vmul.f32 %v3222_v7, %v2478_v9 }
0x1adc   :  { %2482 = vrot.lane.b32.xlu0 %v2480_v10, %s3279_s16 }
0x1b4e   :  { %v2483_v55 = vpop.permute.xlu0 %2482 }
0x1b4f   :  { %v2485_v52 = vadd.f32 %v2483_v55, %v2390_v62 }
0x1b51   :  { %3223 = vtanh.f32 %v2485_v52 }
0x1b5b   :  { %v3224_v11 = vpop.eup %3223 }
0x1b5c   :  { %v2487_v14 = vsub.f32 %v2208_v49, %v3224_v11 }
0x1b5e   :  { %2489 = vrot.lane.b32.xlu1 %v2487_v14, %s3280_s3 }
0x1b62   :  { %2504 = vrot.lane.b32.xlu1 %v2578_v6, %s3279_s16 }
0x1bd0   :  { %v2490_v39 = vpop.permute.xlu1 %2489 }
0x1bd1   :  { %v2492_v45 = vmul.f32 %v3222_v7, %v2490_v39 }
0x1bd3   :  { %2494 = vrot.lane.b32.xlu0 %v2492_v45, %s3281_s0 }
0x1bd4   :  { %v2505_v16 = vpop.permute.xlu1 %2504 }
0x1c45   :  { %v2495_v12 = vpop.permute.xlu0 %2494 }
0x1c46   :  { %v2497_v17 = vadd.f32 %v3224_v11, %v2495_v12 }
0x1c48   :  { %v2507_v18 = vmul.f32 %v2505_v16, %v2497_v17 }
0x1c4a   :  { %2509 = vrot.lane.b32.xlu0 %v2507_v18, %s3279_s16 }
0x1cbc   :  { %v2510_v21 = vpop.permute.xlu0 %2509 }
0x1cbd   :  { %v2513_v35 = vsel %vm2512_vm3, %v2510_v21, 0.0 }
0x1cbe   :  { %2514 = vadd.xlane.f32.xlu1 %v2513_v35 }
0x1d4b   :  { %v2515_v59 = vpop.xlane.xlu1 %2514 }
0x1d4c   :  { %v2523_v1 = vadd.f32 %v2579_v2, %v2515_v59 }
0x1d4e   :  { %2525 = vst.msk [vmem:[%s3829_s11] sm:$0xf] %vm2524_vm4, %v2523_v1 }
0x1d4f   :  { %2530 = vsyncpa [#allocation4], 1 }
0x1d50   :  { %2531 = vsyncpa [#allocation6], 1 }

</bundles_post_ra>
